<compile_context>
chip_gen: v7x
topology: tpu7x:2x2x1
jax: 0.10.0
libtpu: 0.0.40
codegen_flags: <defaults>
</compile_context>

<pallas_src>
import jax
import jax.numpy as jnp
from jax.experimental import pallas as pl
from jax.experimental.pallas import tpu as pltpu

# ----- static model hyper-parameters -----
N_NODE_FEATURES = 8
N_EDGE_FEATURES = 3          # == num_relations for RGCNConv
N_HIDDEN = 32
N_OUTPUT = 4
NUM_BLOCKS = 2               # num_convolution_blocks
MAX_DEGREE = 10              # PyG MFConv default
DP1 = MAX_DEGREE + 1
DPAD = 12                    # pad 11 -> 12 so the stacked width is 12*32 = 384 = 3*128
OUT_PAD = 128                # lane-padded head output width


def gnn_kernel(x_ref, ew_ref, eb_ref, arelc_ref, asum_ref, dohw_ref,
               rwc_ref, rroot_ref, rb_ref, mwl_ref, mwr_ref, mbl_ref, fold_ref,
               pool_ref, hw1_ref, hb1_ref, hw2_ref, hb2_ref, out_ref):
    f32, bf16 = jnp.float32, jnp.bfloat16
    n = x_ref.shape[0]
    H = N_HIDDEN

    # hoisted loop-invariant loads / casts (layer loop below is Python-unrolled)
    arelc = arelc_ref[...]                     # [N, R*N] bf16, mean-normalised
    asum = asum_ref[...]                       # [N, N]   bf16, raw edge counts
    deg_mask = dohw_ref[...].astype(f32)       # [N, DPAD*H] one-hot degree mask
    fold = fold_ref[...]                       # [DPAD*H, H] group-sum fold

    # embed: Linear(n_node_features -> n_hidden)
    x = jnp.dot(x_ref[...], ew_ref[...], preferred_element_type=f32) + eb_ref[...]

    for l in range(NUM_BLOCKS):
        # ---- ReLU -> RGCNConv (aggr='mean'; 1/cnt baked into arelc) ----
        #   out_i = x_i @ root + sum_r (A_r/cnt_r @ (x @ W_r))_i + bias
        x = jnp.maximum(x, 0.0)
        # one lane-dense weight matmul for all relations: [N, 3*H]
        xw = jnp.dot(x, rwc_ref[l], preferred_element_type=f32).astype(bf16)
        # vertical relation-major restack -> [3N, H], feeds ONE adjacency matmul
        xw_stack = jnp.concatenate(
            [xw[:, r * H:(r + 1) * H] for r in range(N_EDGE_FEATURES)], axis=0)
        acc = (jnp.dot(x, rroot_ref[l], preferred_element_type=f32) + rb_ref[l]
               + jnp.dot(arelc, xw_stack, preferred_element_type=f32))

        # ---- ReLU -> MFConv (degree-stacked weights, lane-dense width 384) ----
        #   out_i = W_l[deg_i] (sum_{j in N(i)} x_j) + b_l[deg_i] + W_r[deg_i] x_i
        x = jnp.maximum(acc, 0.0)
        hsum = jnp.dot(asum, x.astype(bf16), preferred_element_type=f32)
        tot = (jnp.dot(hsum, mwl_ref[l], preferred_element_type=f32)
               + jnp.dot(x, mwr_ref[l], preferred_element_type=f32)
               + mbl_ref[l])                                     # [N, DPAD*H]
        x = jnp.dot(deg_mask * tot, fold, preferred_element_type=f32)  # select + fold

    # ---- global_add_pool + head (padded lanes on the output path) ----
    pooled = jnp.dot(pool_ref[...], x, preferred_element_type=f32)
    h1 = jnp.maximum(
        jnp.dot(pooled, hw1_ref[...], preferred_element_type=f32) + hb1_ref[...], 0.0)
    out_ref[...] = jnp.dot(h1, hw2_ref[...], preferred_element_type=f32) + hb2_ref[...]


def gnn_forward(x, edge_index, edge_attr, batch, params, num_graphs):
    """Glue: build dense (bf16) graph operators + stacked weights, run the kernel."""
    n = x.shape[0]
    f32, bf16 = jnp.float32, jnp.bfloat16
    edge_type = jnp.argmax(edge_attr, axis=-1)
    src, dst = edge_index[0], edge_index[1]
    ones = jnp.ones(src.shape[0], f32)

    # per-relation dense adjacency [relation, target, source] (raw edge counts);
    # mean normalisation is applied here in f32 and the relations are packed into
    # one horizontally concatenated operator [N, R*N] so the kernel does a single
    # aggregation matmul per layer.
    a_rel = jnp.zeros((N_EDGE_FEATURES, n, n), f32).at[edge_type, dst, src].add(ones)
    cnt = jnp.sum(a_rel, axis=-1, keepdims=True)
    a_rel_norm = a_rel / jnp.maximum(cnt, 1.0)                   # [R, N, N] f32
    a_rel_cat = jnp.transpose(a_rel_norm, (1, 0, 2)).reshape(n, N_EDGE_FEATURES * n)

    # all-edge adjacency (MFConv sum-aggregation) and in-degree one-hot
    a_sum = jnp.zeros((n, n), f32).at[dst, src].add(ones)
    deg = jnp.minimum(jnp.sum(a_sum, axis=-1).astype(jnp.int32), MAX_DEGREE)
    deg_oh = jax.nn.one_hot(deg, DPAD, dtype=f32)                # [N, DPAD]
    deg_oh_wide = jnp.repeat(deg_oh, N_HIDDEN, axis=-1)          # [N, DPAD*H]

    # global_add_pool matrix, padded to a sublane multiple of graphs (exact 0/1, f32)
    g_pad = max(8, -(-num_graphs // 8) * 8)
    pool = (batch[None, :] == jnp.arange(g_pad)[:, None]).astype(f32)   # [g_pad, N]

    # ---- stacked / padded weights for lane-dense matmuls ----
    rw_cat = params['rw'].transpose(0, 2, 1, 3).reshape(
        NUM_BLOCKS, N_HIDDEN, N_EDGE_FEATURES * N_HIDDEN)        # [B, H, 3H]
    pad4 = [(0, 0), (0, DPAD - DP1), (0, 0), (0, 0)]
    mwl = jnp.pad(params['mwl'], pad4).transpose(0, 2, 1, 3).reshape(
        NUM_BLOCKS, N_HIDDEN, DPAD * N_HIDDEN)                   # [B, H, DPAD*H]
    mwr = jnp.pad(params['mwr'], pad4).transpose(0, 2, 1, 3).reshape(
        NUM_BLOCKS, N_HIDDEN, DPAD * N_HIDDEN)
    mbl = jnp.pad(params['mbl'], pad4).reshape(NUM_BLOCKS, 1, DPAD * N_HIDDEN)
    fold = jnp.tile(jnp.eye(N_HIDDEN, dtype=f32), (DPAD, 1))     # [DPAD*H, H]
    hw2p = jnp.zeros((N_HIDDEN, OUT_PAD), f32).at[:, :N_OUTPUT].set(params['hw2'])
    hb2p = jnp.zeros((1, OUT_PAD), f32).at[:, :N_OUTPUT].set(params['hb2'])

    inputs = (x, params['ew'], params['eb'],
              a_rel_cat.astype(bf16), a_sum.astype(bf16), deg_oh_wide.astype(bf16),
              rw_cat, params['rroot'], params['rb'],
              mwl, mwr, mbl, fold,
              pool, params['hw1'], params['hb1'], hw2p, hb2p)

    vmem = pl.BlockSpec(memory_space=pltpu.MemorySpace.VMEM)
    out = pl.pallas_call(
        gnn_kernel,
        out_shape=jax.ShapeDtypeStruct((g_pad, OUT_PAD), jnp.float32),
        in_specs=[vmem] * len(inputs),
        out_specs=vmem,
        compiler_params=pltpu.CompilerParams(vmem_limit_bytes=32 * 1024 * 1024),
    )(*inputs)
    return out[:num_graphs, :N_OUTPUT]


def init_params(key):
    ks = jax.random.split(key, 12)
    s = 0.1
    f = jnp.float32
    return dict(
        ew=jax.random.normal(ks[0], (N_NODE_FEATURES, N_HIDDEN), f) * s,
        eb=jax.random.normal(ks[1], (1, N_HIDDEN), f) * s,
        rw=jax.random.normal(ks[2], (NUM_BLOCKS, N_EDGE_FEATURES, N_HIDDEN, N_HIDDEN), f) * s,
        rroot=jax.random.normal(ks[3], (NUM_BLOCKS, N_HIDDEN, N_HIDDEN), f) * s,
        rb=jax.random.normal(ks[4], (NUM_BLOCKS, 1, N_HIDDEN), f) * s,
        mwl=jax.random.normal(ks[5], (NUM_BLOCKS, DP1, N_HIDDEN, N_HIDDEN), f) * s,
        mbl=jax.random.normal(ks[6], (NUM_BLOCKS, DP1, 1, N_HIDDEN), f) * s,
        mwr=jax.random.normal(ks[7], (NUM_BLOCKS, DP1, N_HIDDEN, N_HIDDEN), f) * s,
        hw1=jax.random.normal(ks[8], (N_HIDDEN, N_HIDDEN), f) * s,
        hb1=jax.random.normal(ks[9], (1, N_HIDDEN), f) * s,
        hw2=jax.random.normal(ks[10], (N_HIDDEN, N_OUTPUT), f) * s,
        hb2=jax.random.normal(ks[11], (1, N_OUTPUT), f) * s,
    )


def reference_forward(x, edge_index, edge_attr, batch, params, num_graphs):
    """Pure-JAX scatter-based reference mirroring torch_geometric semantics (f32)."""
    n = x.shape[0]
    edge_type = jnp.argmax(edge_attr, axis=-1)
    src, dst = edge_index[0], edge_index[1]
    x = x @ params['ew'] + params['eb']
    for l in range(NUM_BLOCKS):
        x = jnp.maximum(x, 0.0)
        out = x @ params['rroot'][l] + params['rb'][l]
        for r in range(N_EDGE_FEATURES):
            m = (edge_type == r).astype(jnp.float32)
            summed = jnp.zeros((n, N_HIDDEN), jnp.float32).at[dst].add(x[src] * m[:, None])
            cnt = jnp.zeros((n,), jnp.float32).at[dst].add(m)
            mean = summed / jnp.maximum(cnt, 1.0)[:, None]
            out = out + mean @ params['rw'][l, r]
        x = jnp.maximum(out, 0.0)
        hsum = jnp.zeros((n, N_HIDDEN), jnp.float32).at[dst].add(x[src])
        deg = jnp.minimum(jnp.zeros((n,), jnp.int32).at[dst].add(1), MAX_DEGREE)
        res = jnp.zeros((n, N_HIDDEN), jnp.float32)
        for d in range(DP1):
            m = (deg == d).astype(jnp.float32)[:, None]
            res = res + m * (hsum @ params['mwl'][l, d] + params['mbl'][l, d]
                             + x @ params['mwr'][l, d])
        x = res
    pooled = jnp.zeros((num_graphs, N_HIDDEN), jnp.float32).at[batch].add(x)
    h1 = jnp.maximum(pooled @ params['hw1'] + params['hb1'], 0.0)
    return h1 @ params['hw2'] + params['hb2']


if __name__ == "__main__":
    key = jax.random.PRNGKey(0)
    k1, k2, k3, k4 = jax.random.split(key, 4)

    N_NODES, N_EDGES, N_GRAPHS = 16, 40, 2
    x = jax.random.normal(k1, (N_NODES, N_NODE_FEATURES), jnp.float32)
    edge_index = jax.random.randint(k2, (2, N_EDGES), 0, N_NODES, dtype=jnp.int32)
    edge_attr = jax.random.normal(k3, (N_EDGES, N_EDGE_FEATURES), jnp.float32)
    batch = jnp.concatenate([jnp.zeros(N_NODES // 2, jnp.int32),
                             jnp.ones(N_NODES - N_NODES // 2, jnp.int32)])
    params = init_params(k4)

    out = gnn_forward(x, edge_index, edge_attr, batch, params, N_GRAPHS)
    out = jax.block_until_ready(out)

    ref = reference_forward(x, edge_index, edge_attr, batch, params, N_GRAPHS)
    assert out.shape == (N_GRAPHS, N_OUTPUT)
    # tolerance accounts for bf16 storage/matmul of the aggregation operands
    assert bool(jnp.allclose(out, ref, atol=3e-2, rtol=3e-2)), "mismatch vs reference"
    print("KERNEL_OK")
</pallas_src>

<mosaic_0001>
module attributes {stable_mosaic.version = 11 : i64} {
  func.func @gnn_kernel(%arg0: memref<16x8xf32, #tpu.memory_space<vmem>>, %arg1: memref<8x32xf32, #tpu.memory_space<vmem>>, %arg2: memref<1x32xf32, #tpu.memory_space<vmem>>, %arg3: memref<16x48xbf16, #tpu.memory_space<vmem>>, %arg4: memref<16x16xbf16, #tpu.memory_space<vmem>>, %arg5: memref<16x384xbf16, #tpu.memory_space<vmem>>, %arg6: memref<2x32x96xf32, #tpu.memory_space<vmem>>, %arg7: memref<2x32x32xf32, #tpu.memory_space<vmem>>, %arg8: memref<2x1x32xf32, #tpu.memory_space<vmem>>, %arg9: memref<2x32x384xf32, #tpu.memory_space<vmem>>, %arg10: memref<2x32x384xf32, #tpu.memory_space<vmem>>, %arg11: memref<2x1x384xf32, #tpu.memory_space<vmem>>, %arg12: memref<384x32xf32, #tpu.memory_space<vmem>>, %arg13: memref<8x16xf32, #tpu.memory_space<vmem>>, %arg14: memref<32x32xf32, #tpu.memory_space<vmem>>, %arg15: memref<1x32xf32, #tpu.memory_space<vmem>>, %arg16: memref<32x128xf32, #tpu.memory_space<vmem>>, %arg17: memref<1x128xf32, #tpu.memory_space<vmem>>, %arg18: memref<8x128xf32, #tpu.memory_space<vmem>>) attributes {dimension_semantics = [], scalar_prefetch = 0 : i64, scratch_operands = 0 : i64, tpu.core_type = #tpu.core_type<tc>} {
    %c0 = arith.constant 0 : index
    %c0_0 = arith.constant 0 : index
    %0 = vector.load %arg3[%c0, %c0_0] : memref<16x48xbf16, #tpu.memory_space<vmem>>, vector<16x48xbf16>
    %c0_1 = arith.constant 0 : index
    %c0_2 = arith.constant 0 : index
    %1 = vector.load %arg4[%c0_1, %c0_2] : memref<16x16xbf16, #tpu.memory_space<vmem>>, vector<16x16xbf16>
    %c0_3 = arith.constant 0 : index
    %c0_4 = arith.constant 0 : index
    %2 = vector.load %arg5[%c0_3, %c0_4] : memref<16x384xbf16, #tpu.memory_space<vmem>>, vector<16x384xbf16>
    %3 = arith.extf %2 : vector<16x384xbf16> to vector<16x384xf32>
    %c0_5 = arith.constant 0 : index
    %c0_6 = arith.constant 0 : index
    %4 = vector.load %arg12[%c0_5, %c0_6] : memref<384x32xf32, #tpu.memory_space<vmem>>, vector<384x32xf32>
    %c0_7 = arith.constant 0 : index
    %c0_8 = arith.constant 0 : index
    %5 = vector.load %arg0[%c0_7, %c0_8] : memref<16x8xf32, #tpu.memory_space<vmem>>, vector<16x8xf32>
    %c0_9 = arith.constant 0 : index
    %c0_10 = arith.constant 0 : index
    %6 = vector.load %arg1[%c0_9, %c0_10] : memref<8x32xf32, #tpu.memory_space<vmem>>, vector<8x32xf32>
    %cst = arith.constant dense<0.000000e+00> : vector<16x32xf32>
    %7 = tpu.matmul %5, %6, %cst {dimension_numbers = #tpu.dot_dimension_numbers<[1], [0], [0], [1], [0, 0, 1, 1], [], []>} : vector<16x8xf32>, vector<8x32xf32>, vector<16x32xf32> -> vector<16x32xf32>
    %c0_11 = arith.constant 0 : index
    %c0_12 = arith.constant 0 : index
    %8 = vector.load %arg2[%c0_11, %c0_12] : memref<1x32xf32, #tpu.memory_space<vmem>>, vector<1x32xf32>
    %9 = vector.broadcast %8 : vector<1x32xf32> to vector<16x32xf32>
    %10 = arith.addf %7, %9 : vector<16x32xf32>
    %cst_13 = arith.constant 0.000000e+00 : f32
    %11 = vector.broadcast %cst_13 : f32 to vector<16x32xf32>
    %12 = arith.maximumf %10, %11 : vector<16x32xf32>
    %c0_14 = arith.constant 0 : index
    %c0_15 = arith.constant 0 : index
    %c0_16 = arith.constant 0 : index
    %13 = vector.load %arg6[%c0_14, %c0_15, %c0_16] : memref<2x32x96xf32, #tpu.memory_space<vmem>>, vector<1x32x96xf32>
    %14 = vector.shape_cast %13 : vector<1x32x96xf32> to vector<32x96xf32>
    %cst_17 = arith.constant dense<0.000000e+00> : vector<16x96xf32>
    %15 = tpu.matmul %12, %14, %cst_17 {dimension_numbers = #tpu.dot_dimension_numbers<[1], [0], [0], [1], [0, 0, 1, 1], [], []>} : vector<16x32xf32>, vector<32x96xf32>, vector<16x96xf32> -> vector<16x96xf32>
    %16 = arith.truncf %15 : vector<16x96xf32> to vector<16x96xbf16>
    %17 = vector.extract_strided_slice %16 {offsets = [0, 0], sizes = [16, 32], strides = [1, 1]} : vector<16x96xbf16> to vector<16x32xbf16>
    %18 = vector.extract_strided_slice %16 {offsets = [0, 32], sizes = [16, 32], strides = [1, 1]} : vector<16x96xbf16> to vector<16x32xbf16>
    %19 = vector.extract_strided_slice %16 {offsets = [0, 64], sizes = [16, 32], strides = [1, 1]} : vector<16x96xbf16> to vector<16x32xbf16>
    %20 = tpu.concatenate %17, %18, %19 in 0 : vector<16x32xbf16>, vector<16x32xbf16>, vector<16x32xbf16> -> vector<48x32xbf16>
    %c0_18 = arith.constant 0 : index
    %c0_19 = arith.constant 0 : index
    %c0_20 = arith.constant 0 : index
    %21 = vector.load %arg7[%c0_18, %c0_19, %c0_20] : memref<2x32x32xf32, #tpu.memory_space<vmem>>, vector<1x32x32xf32>
    %22 = vector.shape_cast %21 : vector<1x32x32xf32> to vector<32x32xf32>
    %cst_21 = arith.constant dense<0.000000e+00> : vector<16x32xf32>
    %23 = tpu.matmul %12, %22, %cst_21 {dimension_numbers = #tpu.dot_dimension_numbers<[1], [0], [0], [1], [0, 0, 1, 1], [], []>} : vector<16x32xf32>, vector<32x32xf32>, vector<16x32xf32> -> vector<16x32xf32>
    %c0_22 = arith.constant 0 : index
    %c0_23 = arith.constant 0 : index
    %c0_24 = arith.constant 0 : index
    %24 = vector.load %arg8[%c0_22, %c0_23, %c0_24] : memref<2x1x32xf32, #tpu.memory_space<vmem>>, vector<1x1x32xf32>
    %25 = vector.shape_cast %24 : vector<1x1x32xf32> to vector<1x32xf32>
    %26 = vector.broadcast %25 : vector<1x32xf32> to vector<16x32xf32>
    %27 = arith.addf %23, %26 : vector<16x32xf32>
    %cst_25 = arith.constant dense<0.000000e+00> : vector<16x32xf32>
    %28 = tpu.matmul %0, %20, %cst_25 {dimension_numbers = #tpu.dot_dimension_numbers<[1], [0], [0], [1], [0, 0, 1, 1], [], []>} : vector<16x48xbf16>, vector<48x32xbf16>, vector<16x32xf32> -> vector<16x32xf32>
    %29 = arith.addf %27, %28 : vector<16x32xf32>
    %cst_26 = arith.constant 0.000000e+00 : f32
    %30 = vector.broadcast %cst_26 : f32 to vector<16x32xf32>
    %31 = arith.maximumf %29, %30 : vector<16x32xf32>
    %32 = arith.truncf %31 : vector<16x32xf32> to vector<16x32xbf16>
    %cst_27 = arith.constant dense<0.000000e+00> : vector<16x32xf32>
    %33 = tpu.matmul %1, %32, %cst_27 {dimension_numbers = #tpu.dot_dimension_numbers<[1], [0], [0], [1], [0, 0, 1, 1], [], []>} : vector<16x16xbf16>, vector<16x32xbf16>, vector<16x32xf32> -> vector<16x32xf32>
    %c0_28 = arith.constant 0 : index
    %c0_29 = arith.constant 0 : index
    %c0_30 = arith.constant 0 : index
    %34 = vector.load %arg9[%c0_28, %c0_29, %c0_30] : memref<2x32x384xf32, #tpu.memory_space<vmem>>, vector<1x32x384xf32>
    %35 = vector.shape_cast %34 : vector<1x32x384xf32> to vector<32x384xf32>
    %cst_31 = arith.constant dense<0.000000e+00> : vector<16x384xf32>
    %36 = tpu.matmul %33, %35, %cst_31 {dimension_numbers = #tpu.dot_dimension_numbers<[1], [0], [0], [1], [0, 0, 1, 1], [], []>} : vector<16x32xf32>, vector<32x384xf32>, vector<16x384xf32> -> vector<16x384xf32>
    %c0_32 = arith.constant 0 : index
    %c0_33 = arith.constant 0 : index
    %c0_34 = arith.constant 0 : index
    %37 = vector.load %arg10[%c0_32, %c0_33, %c0_34] : memref<2x32x384xf32, #tpu.memory_space<vmem>>, vector<1x32x384xf32>
    %38 = vector.shape_cast %37 : vector<1x32x384xf32> to vector<32x384xf32>
    %cst_35 = arith.constant dense<0.000000e+00> : vector<16x384xf32>
    %39 = tpu.matmul %31, %38, %cst_35 {dimension_numbers = #tpu.dot_dimension_numbers<[1], [0], [0], [1], [0, 0, 1, 1], [], []>} : vector<16x32xf32>, vector<32x384xf32>, vector<16x384xf32> -> vector<16x384xf32>
    %40 = arith.addf %36, %39 : vector<16x384xf32>
    %c0_36 = arith.constant 0 : index
    %c0_37 = arith.constant 0 : index
    %c0_38 = arith.constant 0 : index
    %41 = vector.load %arg11[%c0_36, %c0_37, %c0_38] : memref<2x1x384xf32, #tpu.memory_space<vmem>>, vector<1x1x384xf32>
    %42 = vector.shape_cast %41 : vector<1x1x384xf32> to vector<1x384xf32>
    %43 = vector.broadcast %42 : vector<1x384xf32> to vector<16x384xf32>
    %44 = arith.addf %40, %43 : vector<16x384xf32>
    %45 = arith.mulf %3, %44 : vector<16x384xf32>
    %cst_39 = arith.constant dense<0.000000e+00> : vector<16x32xf32>
    %46 = tpu.matmul %45, %4, %cst_39 {dimension_numbers = #tpu.dot_dimension_numbers<[1], [0], [0], [1], [0, 0, 1, 1], [], []>} : vector<16x384xf32>, vector<384x32xf32>, vector<16x32xf32> -> vector<16x32xf32>
    %cst_40 = arith.constant 0.000000e+00 : f32
    %47 = vector.broadcast %cst_40 : f32 to vector<16x32xf32>
    %48 = arith.maximumf %46, %47 : vector<16x32xf32>
    %c1 = arith.constant 1 : index
    %c0_41 = arith.constant 0 : index
    %c0_42 = arith.constant 0 : index
    %49 = vector.load %arg6[%c1, %c0_41, %c0_42] : memref<2x32x96xf32, #tpu.memory_space<vmem>>, vector<1x32x96xf32>
    %50 = vector.shape_cast %49 : vector<1x32x96xf32> to vector<32x96xf32>
    %cst_43 = arith.constant dense<0.000000e+00> : vector<16x96xf32>
    %51 = tpu.matmul %48, %50, %cst_43 {dimension_numbers = #tpu.dot_dimension_numbers<[1], [0], [0], [1], [0, 0, 1, 1], [], []>} : vector<16x32xf32>, vector<32x96xf32>, vector<16x96xf32> -> vector<16x96xf32>
    %52 = arith.truncf %51 : vector<16x96xf32> to vector<16x96xbf16>
    %53 = vector.extract_strided_slice %52 {offsets = [0, 0], sizes = [16, 32], strides = [1, 1]} : vector<16x96xbf16> to vector<16x32xbf16>
    %54 = vector.extract_strided_slice %52 {offsets = [0, 32], sizes = [16, 32], strides = [1, 1]} : vector<16x96xbf16> to vector<16x32xbf16>
    %55 = vector.extract_strided_slice %52 {offsets = [0, 64], sizes = [16, 32], strides = [1, 1]} : vector<16x96xbf16> to vector<16x32xbf16>
    %56 = tpu.concatenate %53, %54, %55 in 0 : vector<16x32xbf16>, vector<16x32xbf16>, vector<16x32xbf16> -> vector<48x32xbf16>
    %c1_44 = arith.constant 1 : index
    %c0_45 = arith.constant 0 : index
    %c0_46 = arith.constant 0 : index
    %57 = vector.load %arg7[%c1_44, %c0_45, %c0_46] : memref<2x32x32xf32, #tpu.memory_space<vmem>>, vector<1x32x32xf32>
    %58 = vector.shape_cast %57 : vector<1x32x32xf32> to vector<32x32xf32>
    %cst_47 = arith.constant dense<0.000000e+00> : vector<16x32xf32>
    %59 = tpu.matmul %48, %58, %cst_47 {dimension_numbers = #tpu.dot_dimension_numbers<[1], [0], [0], [1], [0, 0, 1, 1], [], []>} : vector<16x32xf32>, vector<32x32xf32>, vector<16x32xf32> -> vector<16x32xf32>
    %c1_48 = arith.constant 1 : index
    %c0_49 = arith.constant 0 : index
    %c0_50 = arith.constant 0 : index
    %60 = vector.load %arg8[%c1_48, %c0_49, %c0_50] : memref<2x1x32xf32, #tpu.memory_space<vmem>>, vector<1x1x32xf32>
    %61 = vector.shape_cast %60 : vector<1x1x32xf32> to vector<1x32xf32>
    %62 = vector.broadcast %61 : vector<1x32xf32> to vector<16x32xf32>
    %63 = arith.addf %59, %62 : vector<16x32xf32>
    %cst_51 = arith.constant dense<0.000000e+00> : vector<16x32xf32>
    %64 = tpu.matmul %0, %56, %cst_51 {dimension_numbers = #tpu.dot_dimension_numbers<[1], [0], [0], [1], [0, 0, 1, 1], [], []>} : vector<16x48xbf16>, vector<48x32xbf16>, vector<16x32xf32> -> vector<16x32xf32>
    %65 = arith.addf %63, %64 : vector<16x32xf32>
    %cst_52 = arith.constant 0.000000e+00 : f32
    %66 = vector.broadcast %cst_52 : f32 to vector<16x32xf32>
    %67 = arith.maximumf %65, %66 : vector<16x32xf32>
    %68 = arith.truncf %67 : vector<16x32xf32> to vector<16x32xbf16>
    %cst_53 = arith.constant dense<0.000000e+00> : vector<16x32xf32>
    %69 = tpu.matmul %1, %68, %cst_53 {dimension_numbers = #tpu.dot_dimension_numbers<[1], [0], [0], [1], [0, 0, 1, 1], [], []>} : vector<16x16xbf16>, vector<16x32xbf16>, vector<16x32xf32> -> vector<16x32xf32>
    %c1_54 = arith.constant 1 : index
    %c0_55 = arith.constant 0 : index
    %c0_56 = arith.constant 0 : index
    %70 = vector.load %arg9[%c1_54, %c0_55, %c0_56] : memref<2x32x384xf32, #tpu.memory_space<vmem>>, vector<1x32x384xf32>
    %71 = vector.shape_cast %70 : vector<1x32x384xf32> to vector<32x384xf32>
    %cst_57 = arith.constant dense<0.000000e+00> : vector<16x384xf32>
    %72 = tpu.matmul %69, %71, %cst_57 {dimension_numbers = #tpu.dot_dimension_numbers<[1], [0], [0], [1], [0, 0, 1, 1], [], []>} : vector<16x32xf32>, vector<32x384xf32>, vector<16x384xf32> -> vector<16x384xf32>
    %c1_58 = arith.constant 1 : index
    %c0_59 = arith.constant 0 : index
    %c0_60 = arith.constant 0 : index
    %73 = vector.load %arg10[%c1_58, %c0_59, %c0_60] : memref<2x32x384xf32, #tpu.memory_space<vmem>>, vector<1x32x384xf32>
    %74 = vector.shape_cast %73 : vector<1x32x384xf32> to vector<32x384xf32>
    %cst_61 = arith.constant dense<0.000000e+00> : vector<16x384xf32>
    %75 = tpu.matmul %67, %74, %cst_61 {dimension_numbers = #tpu.dot_dimension_numbers<[1], [0], [0], [1], [0, 0, 1, 1], [], []>} : vector<16x32xf32>, vector<32x384xf32>, vector<16x384xf32> -> vector<16x384xf32>
    %76 = arith.addf %72, %75 : vector<16x384xf32>
    %c1_62 = arith.constant 1 : index
    %c0_63 = arith.constant 0 : index
    %c0_64 = arith.constant 0 : index
    %77 = vector.load %arg11[%c1_62, %c0_63, %c0_64] : memref<2x1x384xf32, #tpu.memory_space<vmem>>, vector<1x1x384xf32>
    %78 = vector.shape_cast %77 : vector<1x1x384xf32> to vector<1x384xf32>
    %79 = vector.broadcast %78 : vector<1x384xf32> to vector<16x384xf32>
    %80 = arith.addf %76, %79 : vector<16x384xf32>
    %81 = arith.mulf %3, %80 : vector<16x384xf32>
    %cst_65 = arith.constant dense<0.000000e+00> : vector<16x32xf32>
    %82 = tpu.matmul %81, %4, %cst_65 {dimension_numbers = #tpu.dot_dimension_numbers<[1], [0], [0], [1], [0, 0, 1, 1], [], []>} : vector<16x384xf32>, vector<384x32xf32>, vector<16x32xf32> -> vector<16x32xf32>
    %c0_66 = arith.constant 0 : index
    %c0_67 = arith.constant 0 : index
    %83 = vector.load %arg13[%c0_66, %c0_67] : memref<8x16xf32, #tpu.memory_space<vmem>>, vector<8x16xf32>
    %cst_68 = arith.constant dense<0.000000e+00> : vector<8x32xf32>
    %84 = tpu.matmul %83, %82, %cst_68 {dimension_numbers = #tpu.dot_dimension_numbers<[1], [0], [0], [1], [0, 0, 1, 1], [], []>} : vector<8x16xf32>, vector<16x32xf32>, vector<8x32xf32> -> vector<8x32xf32>
    %c0_69 = arith.constant 0 : index
    %c0_70 = arith.constant 0 : index
    %85 = vector.load %arg14[%c0_69, %c0_70] : memref<32x32xf32, #tpu.memory_space<vmem>>, vector<32x32xf32>
    %cst_71 = arith.constant dense<0.000000e+00> : vector<8x32xf32>
    %86 = tpu.matmul %84, %85, %cst_71 {dimension_numbers = #tpu.dot_dimension_numbers<[1], [0], [0], [1], [0, 0, 1, 1], [], []>} : vector<8x32xf32>, vector<32x32xf32>, vector<8x32xf32> -> vector<8x32xf32>
    %c0_72 = arith.constant 0 : index
    %c0_73 = arith.constant 0 : index
    %87 = vector.load %arg15[%c0_72, %c0_73] : memref<1x32xf32, #tpu.memory_space<vmem>>, vector<1x32xf32>
    %88 = vector.broadcast %87 : vector<1x32xf32> to vector<8x32xf32>
    %89 = arith.addf %86, %88 : vector<8x32xf32>
    %cst_74 = arith.constant 0.000000e+00 : f32
    %90 = vector.broadcast %cst_74 : f32 to vector<8x32xf32>
    %91 = arith.maximumf %89, %90 : vector<8x32xf32>
    %c0_75 = arith.constant 0 : index
    %c0_76 = arith.constant 0 : index
    %92 = vector.load %arg16[%c0_75, %c0_76] : memref<32x128xf32, #tpu.memory_space<vmem>>, vector<32x128xf32>
    %cst_77 = arith.constant dense<0.000000e+00> : vector<8x128xf32>
    %93 = tpu.matmul %91, %92, %cst_77 {dimension_numbers = #tpu.dot_dimension_numbers<[1], [0], [0], [1], [0, 0, 1, 1], [], []>} : vector<8x32xf32>, vector<32x128xf32>, vector<8x128xf32> -> vector<8x128xf32>
    %c0_78 = arith.constant 0 : index
    %c0_79 = arith.constant 0 : index
    %94 = vector.load %arg17[%c0_78, %c0_79] : memref<1x128xf32, #tpu.memory_space<vmem>>, vector<1x128xf32>
    %95 = vector.broadcast %94 : vector<1x128xf32> to vector<8x128xf32>
    %96 = arith.addf %93, %95 : vector<8x128xf32>
    %c0_80 = arith.constant 0 : index
    %c0_81 = arith.constant 0 : index
    %97 = vector.load %arg18[%c0_80, %c0_81] : memref<8x128xf32, #tpu.memory_space<vmem>>, vector<8x128xf32>
    tpu.vector_store %arg18[%c0_80, %c0_81], %96 {strides = array<i32>} : memref<8x128xf32, #tpu.memory_space<vmem>>, vector<8x128xf32>,
    return
  }
}

</mosaic_0001>

<bundles_post_ra>
// kernel: tpu_custom_call.1
= control target key start
LH: loop header
LB: loop body
LE: loop exit
PB: predicated region body
PF: predicated region fallthrough
CT: control target
= control target key end

     0   :  { %s3942_s0 = inlined_call_operand.vmem [shape: f32[16,8], index: 0, kind: input, shape index: {}]   ;;  %s3943_s1 = inlined_call_operand.hbm [shape: f32[8,32], index: 1, kind: input, shape index: {}]   ;;  %s3944_s2 = inlined_call_operand.vmem [shape: f32[1,32], index: 2, kind: input, shape index: {}]   ;;  %s3945_s3 = inlined_call_operand.hbm [shape: bf16[16,48], index: 3, kind: input, shape index: {}]   ;;  %s3946_s4 = inlined_call_operand.hbm [shape: bf16[16,16], index: 4, kind: input, shape index: {}]   ;;  %s3947_s5 = inlined_call_operand.hbm [shape: bf16[16,384], index: 5, kind: input, shape index: {}]   ;;  %s3948_s6 = inlined_call_operand.vmem [shape: f32[2,32,96], index: 6, kind: input, shape index: {}]   ;;  %s3949_s7 = inlined_call_operand.vmem [shape: f32[2,32,32], index: 7, kind: input, shape index: {}]   ;;  %s3950_s8 = inlined_call_operand.vmem [shape: f32[2,1,32], index: 8, kind: input, shape index: {}]   ;;  %s3951_s9 = inlined_call_operand.vmem [shape: f32[2,32,384], index: 9, kind: input, shape index: {}]   ;;  %s3952_s10 = inlined_call_operand.vmem [shape: f32[2,32,384], index: 10, kind: input, shape index: {}]   ;;  %s3953_s11 = inlined_call_operand.hbm [shape: f32[2,1,384], index: 11, kind: input, shape index: {}]   ;;  %s3954_s12 = inlined_call_operand.vmem [shape: f32[384,32], index: 12, kind: input, shape index: {}]   ;;  %s3955_s13 = inlined_call_operand.hbm [shape: f32[8,16], index: 13, kind: input, shape index: {}]   ;;  %s3956_s14 = inlined_call_operand.vmem [shape: f32[32,32], index: 14, kind: input, shape index: {}]   ;;  %s3957_s15 = inlined_call_operand.vmem [shape: f32[1,32], index: 15, kind: input, shape index: {}]   ;;  %s3958_s16 = inlined_call_operand.hbm [shape: f32[32,128], index: 16, kind: input, shape index: {}]   ;;  %s3959_s17 = inlined_call_operand.vmem [shape: f32[1,128], index: 17, kind: input, shape index: {}]   ;;  %s3960_s18 = inlined_call_operand.hbm [shape: f32[8,128], index: 18, kind: output, shape index: {}]  }
   0x1   :  { %3966 = sst [smem:[#allocation20_spill]] %s3942_s0 }
   0x2   :  { %3967 = sst [smem:[#allocation21_spill]] %s3943_s1 }
   0x3   :  { %3968 = sst [smem:[#allocation22_spill]] %s3944_s2 }
   0x4   :  { %23 = vsyncpa [#allocation3], 0 }
   0x5   :  { %24 = vsyncpa [#allocation6], 0 }
   0x6   :  { %25 = vsyncpa [#allocation9], 0 }
   0x7   :  { %26 = vsyncpa [#allocation12], 0 }
   0x8   :  { %27 = vsyncpa [#allocation4], 0  ;;  %s3111_s27 = smov [#allocation5]   ;;  %s2925_s0 = scalar_lea.hbm %s3945_s3, 128 }
   0x9   :  { %s47_s28 = sshll.u32 %s3111_s27, 4  ;;  %p2926_p0 = scmp.ne.s32.totalorder %s3945_s3, %s2925_s0  ;;  %s48_s28 = int_to_ptr.vmem [resolvable:$true] %s47_s28 }
   0xa   :  { %p2929_p1 = scmp.lt.u32.totalorder %s2925_s0, %s3945_s3 }
   0xc   :  { %p2931_p2 = pnand %p2929_p1, %p2926_p0 }
   0xe   :  { %2934 = shalt.err (!%p2931_p2)
}
   0xf   :  { %s2935_s22 = scalar_lea.vmem %s48_s28, 128  ;;  %p2940_p4 = scmp.lt.s32.totalorder %s48_s28, %s48_s28 }
  0x10   :  { %p2936_p3 = scmp.ne.s32.totalorder %s48_s28, %s2935_s22  ;;  %p2941_p5 = scmp.lt.s32.totalorder %s2935_s22, %s2935_s22 }
  0x12   :  { %p2942_p6 = por %p2941_p5, %p2940_p4 }
  0x14   :  { %p2943_p7 = pnand %p2942_p6, %p2936_p3 }
  0x16   :  { %2946 = shalt.err (!%p2943_p7)
}
  0x17   :  { %s3963_s2 = smov 64   ;;  %s3965_s23 = smov 4  }
  0x18   :  { %53 = dma.hbm_to_vmem [thread:$0]  %s3945_s3, 128, %s48_s28, [#allocation6], %s3963_s2, %s3963_s2, %s3965_s23  }
  0x19   :  { %s3114_s26 = smov [#allocation8]   ;;  %s2947_s0 = scalar_lea.hbm %s3947_s5, 384 }
  0x1a   :  { %s71_s27 = sshll.u32 %s3114_s26, 4  ;;  %p2948_p8 = scmp.ne.s32.totalorder %s3947_s5, %s2947_s0  ;;  %s72_s27 = int_to_ptr.vmem [resolvable:$true] %s71_s27 }
  0x1b   :  { %p2951_p9 = scmp.lt.u32.totalorder %s2947_s0, %s3947_s5 }
  0x1d   :  { %p2953_p10 = pnand %p2951_p9, %p2948_p8 }
  0x1f   :  { %2956 = shalt.err (!%p2953_p10)
}
  0x20   :  { %s2957_s22 = scalar_lea.vmem %s72_s27, 384  ;;  %p2962_p12 = scmp.lt.s32.totalorder %s72_s27, %s72_s27 }
  0x21   :  { %p2958_p11 = scmp.ne.s32.totalorder %s72_s27, %s2957_s22  ;;  %p2963_p13 = scmp.lt.s32.totalorder %s2957_s22, %s2957_s22 }
  0x23   :  { %p2964_p0 = por %p2963_p13, %p2962_p12 }
  0x25   :  { %p2965_p1 = pnand %p2964_p0, %p2958_p11 }
  0x27   :  { %2968 = shalt.err (!%p2965_p1)
}
  0x28   :  { %s3115_s3 = smov 192   ;;  %s3116_s28 = smov 12  }
  0x29   :  { %77 = dma.hbm_to_vmem [thread:$0]  %s3947_s5, 384, %s72_s27, [#allocation9], %s3115_s3, %s3115_s3, %s3116_s28  }
  0x2a   :  { %s3117_s26 = smov [#allocation11]   ;;  %s3118_s30 = smov [#allocation2]  }
  0x2b   :  { %s108_s29 = sshll.u32 %s3117_s26, 4  ;;  %s36_s19 = sshll.u32 %s3118_s30, 4  ;;  %s109_s29 = int_to_ptr.vmem [resolvable:$true] %s108_s29  ;;  %s37_s19 = int_to_ptr.vmem [resolvable:$true] %s36_s19 }
  0x2c   :  { %s2969_s20 = scalar_lea.hbm %s3955_s13, 128 }
  0x2d   :  { %p2970_p2 = scmp.ne.s32.totalorder %s3955_s13, %s2969_s20  ;;  %p2973_p3 = scmp.lt.u32.totalorder %s2969_s20, %s3955_s13 }
  0x2f   :  { %p2975_p4 = pnand %p2973_p3, %p2970_p2 }
  0x31   :  { %2978 = shalt.err (!%p2975_p4)
}
  0x32   :  { %s2979_s5 = scalar_lea.vmem %s109_s29, 128  ;;  %p2984_p6 = scmp.lt.s32.totalorder %s109_s29, %s109_s29 }
  0x33   :  { %p2980_p5 = scmp.ne.s32.totalorder %s109_s29, %s2979_s5  ;;  %p2985_p7 = scmp.lt.s32.totalorder %s2979_s5, %s2979_s5 }
  0x35   :  { %p2986_p8 = por %p2985_p7, %p2984_p6 }
  0x37   :  { %p2987_p9 = pnand %p2986_p8, %p2980_p5 }
  0x39   :  { %2990 = shalt.err (!%p2987_p9)
}
  0x3a   :  { %111 = dma.hbm_to_vmem [thread:$0]  %s3955_s13, 128, %s109_s29, [#allocation12]  }
  0x3b   :  { %s3969_s25 = sld [smem:[#allocation21_spill]] }
  0x41   :  { %s2991_s26 = scalar_lea.hbm %s3969_s25, 128 }
  0x42   :  { %p2992_p10 = scmp.ne.s32.totalorder %s3969_s25, %s2991_s26  ;;  %p2995_p11 = scmp.lt.u32.totalorder %s2991_s26, %s3969_s25 }
  0x44   :  { %p2997_p12 = pnand %p2995_p11, %p2992_p10 }
  0x46   :  { %3000 = shalt.err (!%p2997_p12)
}
  0x47   :  { %s3001_s1 = scalar_lea.vmem %s37_s19, 128  ;;  %p3006_p0 = scmp.lt.s32.totalorder %s37_s19, %s37_s19 }
  0x48   :  { %p3002_p13 = scmp.ne.s32.totalorder %s37_s19, %s3001_s1  ;;  %p3007_p1 = scmp.lt.s32.totalorder %s3001_s1, %s3001_s1 }
  0x4a   :  { %p3008_p2 = por %p3007_p1, %p3006_p0 }
  0x4c   :  { %p3009_p3 = pnand %p3008_p2, %p3002_p13 }
  0x4e   :  { %3012 = shalt.err (!%p3009_p3)
}
  0x4f   :  { %39 = dma.hbm_to_vmem [thread:$0]  %s3969_s25, 128, %s37_s19, [#allocation3]  }
  0x50   :  { %s3119_s20 = smov [#allocation7]   ;;  %s3120_s22 = smov [#allocation10]  }
  0x51   :  { %s59_s21 = sshll.u32 %s3119_s20, 4  ;;  %s93_s5 = sshll.u32 %s3120_s22, 4  ;;  %s60_s21 = int_to_ptr.vmem [resolvable:$true] %s59_s21  ;;  %s3277_s5 = int_to_ptr.vmem [resolvable:$true] %s93_s5 }
  0x52   :  { %s3013_s28 = scalar_lea.hbm %s3946_s4, 128 }
  0x53   :  { %p3014_p4 = scmp.ne.s32.totalorder %s3946_s4, %s3013_s28  ;;  %p3017_p5 = scmp.lt.u32.totalorder %s3013_s28, %s3946_s4 }
  0x55   :  { %p3019_p6 = pnand %p3017_p5, %p3014_p4 }
  0x57   :  { %3022 = shalt.err (!%p3019_p6)
}
  0x58   :  { %s3023_s19 = scalar_lea.vmem %s60_s21, 128  ;;  %p3028_p8 = scmp.lt.s32.totalorder %s60_s21, %s60_s21 }
  0x59   :  { %p3024_p7 = scmp.ne.s32.totalorder %s60_s21, %s3023_s19  ;;  %p3029_p9 = scmp.lt.s32.totalorder %s3023_s19, %s3023_s19 }
  0x5b   :  { %p3030_p10 = por %p3029_p9, %p3028_p8 }
  0x5d   :  { %p3031_p11 = pnand %p3030_p10, %p3024_p7 }
  0x5f   :  { %3034 = shalt.err (!%p3031_p11)
}
  0x60   :  { %s3970_s25 = smov 4   ;;  %s3971_s23 = smov 64  }
  0x61   :  { %65 = dma.hbm_to_vmem [thread:$0]  %s3946_s4, 128, %s60_s21, [#allocation6], %s3971_s23, %s3971_s23, %s3970_s25  }
  0x62   :  { %s3035_s20 = scalar_lea.hbm %s3953_s11, 96 }
  0x63   :  { %p3036_p12 = scmp.ne.s32.totalorder %s3953_s11, %s3035_s20  ;;  %p3039_p13 = scmp.lt.u32.totalorder %s3035_s20, %s3953_s11 }
  0x65   :  { %p3041_p0 = pnand %p3039_p13, %p3036_p12 }
  0x67   :  { %3044 = shalt.err (!%p3041_p0)
}
  0x68   :  { %s3045_s24 = scalar_lea.vmem %s3277_s5, 96  ;;  %p3050_p2 = scmp.lt.s32.totalorder %s3277_s5, %s3277_s5 }
  0x69   :  { %p3046_p1 = scmp.ne.s32.totalorder %s3277_s5, %s3045_s24  ;;  %p3051_p3 = scmp.lt.s32.totalorder %s3045_s24, %s3045_s24 }
  0x6b   :  { %p3052_p4 = por %p3051_p3, %p3050_p2 }
  0x6d   :  { %p3053_p5 = pnand %p3052_p4, %p3046_p1 }
  0x6f   :  { %3056 = shalt.err (!%p3053_p5)
}
  0x70   :  { %s3121_s4 = smov 48   ;;  %s3122_s21 = smov 3  }
  0x71   :  { %99 = dma.hbm_to_vmem [thread:$0]  %s3953_s11, 96, %s3277_s5, [#allocation9], %s3121_s4, %s3121_s4, %s3122_s21  }
  0x72   :  { %s3123_s2 = smov [#allocation13]   ;;  %s3057_s1 = scalar_lea.hbm %s3958_s16, 512 }
  0x73   :  { %s121_s19 = sshll.u32 %s3123_s2, 4  ;;  %p3058_p6 = scmp.ne.s32.totalorder %s3958_s16, %s3057_s1  ;;  %s122_s19 = int_to_ptr.vmem [resolvable:$true] %s121_s19 }
  0x74   :  { %p3061_p7 = scmp.lt.u32.totalorder %s3057_s1, %s3958_s16 }
  0x76   :  { %p3063_p8 = pnand %p3061_p7, %p3058_p6 }
  0x78   :  { %3066 = shalt.err (!%p3063_p8)
}
  0x79   :  { %s3067_s27 = scalar_lea.vmem %s122_s19, 512  ;;  %p3072_p10 = scmp.lt.s32.totalorder %s122_s19, %s122_s19 }
  0x7a   :  { %p3068_p9 = scmp.ne.s32.totalorder %s122_s19, %s3067_s27  ;;  %p3073_p11 = scmp.lt.s32.totalorder %s3067_s27, %s3067_s27 }
  0x7c   :  { %p3074_p12 = por %p3073_p11, %p3072_p10 }
  0x7e   :  { %p3075_p13 = pnand %p3074_p12, %p3068_p9 }
  0x80   :  { %3078 = shalt.err (!%p3075_p13)
}
  0x81   :  { %s3124_s11 = smov 128   ;;  %s3125_s5 = smov 8  }
  0x82   :  { %127 = dma.hbm_to_vmem [thread:$0]  %s3958_s16, 512, %s122_s19, [#allocation12], %s3124_s11, %s3124_s11, %s3125_s5  }
  0x83   :  { %3101 = dma.done.wait [#allocation3], 128  }
  0x84   :  { %3102 = vsyncadd [#allocation3], 4294967168 }
  0x85   :  { %3103 = dma.done.wait [#allocation6], 256  }
  0x86   :  { %3104 = vsyncadd [#allocation6], 4294967040 }
  0x87   :  { %3105 = dma.done.wait [#allocation9], 480  }
  0x88   :  { %3106 = vsyncadd [#allocation9], 4294966816 }
  0x89   :  { %3107 = dma.done.wait [#allocation12], 640  }
  0x8a   :  { %3108 = vsyncadd [#allocation12], 4294966656  ;;  %vm224_vm0 = vcmask 64512   ;;  %v216_v0 = vld [vmem:[#allocation2] sm:$0xff]  ;;  %s3972_s21 = sld [smem:[#allocation20_spill]]  ;;  %v308_v3 = vld [vmem:[%s3948_s6] sm:$0xff] }
  0x8b   :  { %2428 = vmatprep.subr.mxu1 %v216_v0  ;;  %v309_v4 = vld [vmem:[%s3948_s6 + $0x8] sm:$0xff]  ;;  %v402_v5 = vld [vmem:[%s3949_s7] sm:$0xff]  ;;  %v310_v9 = vld [vmem:[%s3948_s6 + $0x10] sm:$0xff]  ;;  %s3973_s26 = sld [smem:[#allocation22_spill]]  ;;  %vm312_vm1 = vcmask 261120   ;;  %v3126_v22 = vmov 0.0  }
  0x8c   :  { %2429 = vmatpush3.msra.mxu1 %v216_v0  ;;  %v2652_v6 = vpack.c.bf16 %v309_v4, %v308_v3  ;;  %v403_v7 = vld [vmem:[%s3949_s7 + $0x8] sm:$0xff]  ;;  %v311_v10 = vld [vmem:[%s3948_s6 + $0x18] sm:$0xff]  ;;  %v404_v12 = vld [vmem:[%s3949_s7 + $0x10] sm:$0xff]  ;;  %vm3127_vm2 = vmmov 0   ;;  %s3128_s30 = smov 96   ;;  %vm493_vm3 = vcmask 392192  }
  0x8d   :  { %v2660_v8 = vpack.c.bf16 %v403_v7, %v402_v5  ;;  %v2656_v11 = vpack.c.bf16 %v311_v10, %v310_v9  ;;  %v405_v13 = vld [vmem:[%s3949_s7 + $0x18] sm:$0xff]  ;;  %v607_v28 = vld [vmem:[%s3952_s10 + $0x10] sm:$0xff]  ;;  %v610_v29 = vld [vmem:[%s3952_s10 + $0x28] sm:$0xff]  ;;  %vm548_vm4 = vcmask 130048   ;;  %s3130_s3 = smov [#allocation14]  }
  0x8e   :  { %2653 = vmatprep.subr.bf16.mxu1 %v2652_v6  ;;  %v2664_v14 = vpack.c.bf16 %v405_v13, %v404_v12  ;;  %v2676_v31 = vpack.c.bf16 %v610_v29, %v607_v28  ;;  %v3376_v33 = vld [vmem:[#allocation5] sm:$0xff]   ;;  %v613_v34 = vld [vmem:[%s3952_s10 + $0x40] sm:$0xff]  ;;  %v595_v37 = vld [vmem:[%s3951_s9 + $0x10] sm:$0xff]  ;;  %s2155_s28 = sshll.u32 %s3130_s3, 4  ;;  %s2156_s28 = int_to_ptr.vmem [resolvable:$true] %s2155_s28 }
  0x8f   :  { %2661 = vmatprep.subr.bf16.mxu0 %v2660_v8  ;;  %v616_v35 = vld [vmem:[%s3952_s10 + $0x58] sm:$0xff]  ;;  %v598_v38 = vld [vmem:[%s3951_s9 + $0x28] sm:$0xff]  ;;  %v2172_v40 = vld [vmem:[%s3950_s8] ss:$0 sm:$0xff]  ;;  %s3079_s24 = scalar_lea.vmem %s2156_s28, 128  ;;  %p3084_p1 = scmp.lt.s32.totalorder %s2156_s28, %s2156_s28 }
  0x90   :  { %v214_v1 = vld [vmem:[%s3972_s21] sm:$0xff]  ;;  %v215_v2 = vld [vmem:[%s3972_s21 + $0x8] sm:$0xff]  ;;  %2663 = vmatpush3.bf16.msra.mxu0 %v2660_v8  ;;  %v2680_v36 = vpack.c.bf16 %v616_v35, %v613_v34  ;;  %v2692_v39 = vpack.c.bf16 %v598_v38, %v595_v37  ;;  %v604_v48 = vld [vmem:[%s3951_s9 + $0x58] sm:$0xff]  ;;  %p3080_p0 = scmp.ne.s32.totalorder %s2156_s28, %s3079_s24  ;;  %p3085_p2 = scmp.lt.s32.totalorder %s3079_s24, %s3079_s24 }
  0x91   :  { %2430 = vmatprep.mubr.msk.f32.mxu1 %vm224_vm0, %v214_v1  ;;  %2665 = vmatprep.subr.bf16.mxu0 %v2664_v14  ;;  %v2167_v15 = vld [vmem:[%s3973_s26] ss:$0 sm:$0xff]  ;;  %v606_v52 = vld [vmem:[%s3952_s10 + $0x8] sm:$0xff]  ;;  %v608_v58 = vld [vmem:[%s3952_s10 + $0x18] sm:$0xff] }
  0x92   :  { %2431 = vmatmul.mubr.msk.f32.vlgmr.msra.gmra.mrb[0].mxu1 %vm224_vm0, %v215_v2  ;;  %v601_v47 = vld [vmem:[%s3951_s9 + $0x40] sm:$0xff]  ;;  %v612_v60 = vld [vmem:[%s3952_s10 + $0x38] sm:$0xff]  ;;  %v615_v61 = vld [vmem:[%s3952_s10 + $0x50] sm:$0xff]  ;;  %p3086_p3 = por %p3085_p2, %p3084_p1 }
  0x93   :  { %2655 = vmatpush3.bf16.msra.mxu1 %v2652_v6  ;;  %v609_v53 = vld [vmem:[%s3952_s10 + $0x20] sm:$0xff]  ;;  %v2696_v55 = vpack.c.bf16 %v604_v48, %v601_v47  ;;  %v2672_v0 = vpack.c.bf16 %v615_v61, %v612_v60  ;;  %v611_v1 = vld [vmem:[%s3952_s10 + $0x30] sm:$0xff]  ;;  %v614_v2 = vld [vmem:[%s3952_s10 + $0x48] sm:$0xff] }
  0x94   :  { %2657 = vmatprep.subr.bf16.mxu1 %v2656_v11  ;;  %2667 = vmatpush3.bf16.msra.mxu0 %v2664_v14  ;;  %v2668_v56 = vpack.c.bf16 %v609_v53, %v606_v52  ;;  %v605_v57 = vld [vmem:[%s3952_s10] sm:$0xff]  ;;  %v594_v3 = vld [vmem:[%s3951_s9 + $0x8] sm:$0xff]  ;;  %v2674_v5 = vpack.c.bf16 %v614_v2, %v611_v1  ;;  %v596_v8 = vld [vmem:[%s3951_s9 + $0x18] sm:$0xff]  ;;  %p3087_p4 = pnand %p3086_p3, %p3080_p0 }
  0x95   :  { %2465 = vmatprep.subr.bf16.mxu0 %v3126_v22  ;;  %v3421_v62 = vld [vmem:[#allocation7] sm:$0xff]   ;;  %v2670_v63 = vpack.c.bf16 %v608_v58, %v605_v57  ;;  %v600_v9 = vld [vmem:[%s3951_s9 + $0x38] sm:$0xff]  ;;  %v603_v10 = vld [vmem:[%s3951_s9 + $0x50] sm:$0xff] }
  0x96   :  { %v597_v4 = vld [vmem:[%s3951_s9 + $0x20] sm:$0xff]  ;;  %v2688_v12 = vpack.c.bf16 %v603_v10, %v600_v9  ;;  %v599_v13 = vld [vmem:[%s3951_s9 + $0x30] sm:$0xff]  ;;  %v602_v14 = vld [vmem:[%s3951_s9 + $0x48] sm:$0xff] }
  0x97   :  { %2659 = vmatpush3.bf16.msra.mxu1 %v2656_v11  ;;  %v2684_v6 = vpack.c.bf16 %v597_v4, %v594_v3  ;;  %v593_v7 = vld [vmem:[%s3951_s9] sm:$0xff]  ;;  %v200_v28 = vld [vmem:[%s3954_s12 + $0x110] sm:$0xff]  ;;  %v201_v29 = vld [vmem:[%s3954_s12 + $0x118] sm:$0xff] }
  0x98   :  { %2455 = vmatprep.subr.bf16.mxu1 %v3126_v22  ;;  %v2686_v11 = vpack.c.bf16 %v596_v8, %v593_v7  ;;  %v186_v35 = vld [vmem:[%s3954_s12 + $0xa0] sm:$0xff]  ;;  %v3514_v38 = vpack.c.bf16 %v201_v29, %v200_v28  ;;  %v188_v47 = vld [vmem:[%s3954_s12 + $0xb0] sm:$0xff]  ;;  %v189_v48 = vld [vmem:[%s3954_s12 + $0xb8] sm:$0xff] }
  0x99   :  { %v205_v52 = vld [vmem:[%s3954_s12 + $0x138] sm:$0xff]  ;;  %v3557_v53 = vpack.c.bf16 %v189_v48, %v188_v47  ;;  %v191_v57 = vld [vmem:[%s3954_s12 + $0xc8] sm:$0xff]  ;;  %v206_v60 = vld [vmem:[%s3954_s12 + $0x140] sm:$0xff] }
  0x9a   :  { %v207_v61 = vld [vmem:[%s3954_s12 + $0x148] sm:$0xff]  ;;  %v192_v2 = vld [vmem:[%s3954_s12 + $0xd0] sm:$0xff]  ;;  %v193_v3 = vld [vmem:[%s3954_s12 + $0xd8] sm:$0xff] }
  0x9b   :  { %v175_v1 = vld [vmem:[%s3954_s12 + $0x48] sm:$0xff]  ;;  %v3601_v4 = vpack.c.bf16 %v207_v61, %v206_v60  ;;  %v209_v7 = vld [vmem:[%s3954_s12 + $0x158] sm:$0xff]  ;;  %v3613_v8 = vpack.c.bf16 %v193_v3, %v192_v2  ;;  %v176_v9 = vld [vmem:[%s3954_s12 + $0x50] sm:$0xff] }
  0x9c   :  { %v177_v10 = vld [vmem:[%s3954_s12 + $0x58] sm:$0xff]  ;;  %v180_v29 = vld [vmem:[%s3954_s12 + $0x70] sm:$0xff] }
  0x9d   :  { %v3706_v61 = vld [vmem:[#allocation8 + $0xc] sm:$0xff] }
 0x165   :  { %v2432_v16 = vpop.f32.mrb[0].mxu1 }
 0x166   :  { %v303_v17 = vadd.f32 %v2432_v16, %v2167_v15  ;;  %v297_v18 = vpop.f32.mrb[1].mxu1  ;;  %v182_v16 = vld [vmem:[%s3954_s12 + $0x80] sm:$0xff] }
 0x167   :  { %v298_v19 = vadd.f32 %v2167_v15, %v297_v18  ;;  %v2690_v15 = vpack.c.bf16 %v602_v14, %v599_v13  ;;  %v3632_v14 = vpack.c.bf16 %v177_v10, %v176_v9 }
 0x168   :  { %v307_v21 = vmax.f32 %v303_v17, 0.0  ;;  %v183_v17 = vld [vmem:[%s3954_s12 + $0x88] sm:$0xff] }
 0x169   :  { %v306_v20 = vmax.f32 %v298_v19, 0.0  ;;  %v3466_v18 = vpack.c.bf16 %v183_v17, %v182_v16  ;;  %v198_v19 = vld [vmem:[%s3954_s12 + $0x100] sm:$0xff]  ;;  %v179_v17 = vld [vmem:[%s3954_s12 + $0x68] sm:$0xff] }
 0x16a   :  { %v178_v16 = vld [vmem:[%s3954_s12 + $0x60] sm:$0xff] }
 0x16b   :  { %2441 = vmatprep.mubr.msk.f32.mxu1 %vm312_vm1, %v306_v20  ;;  %2452 = vmatprep.mubr.msk.f32.mxu0 %vm312_vm1, %v306_v20  ;;  %v199_v20 = vld [vmem:[%s3954_s12 + $0x108] sm:$0xff] }
 0x16c   :  { %2442 = vmatmul.mubr.msk.f32.vlgmr.msra.gmra.mrb[2].mxu1 %vm312_vm1, %v307_v21  ;;  %2453 = vmatmul.mubr.msk.f32.vlgmr.msra.gmra.mrb[0].mxu0 %vm312_vm1, %v307_v21  ;;  %v3474_v21 = vpack.c.bf16 %v199_v20, %v198_v19  ;;  %v3648_v19 = vpack.c.bf16 %v179_v17, %v178_v16  ;;  %v210_v20 = vld [vmem:[%s3954_s12 + $0x160] sm:$0xff]  ;;  %v163_v17 = vunpack.c.l.bf16 %v3706_v61 }
 0x16d   :  { %2461 = vmatprep.mubr.msk.bf16.mxu1 %vm3127_vm2, %v3126_v22  ;;  %2467 = vmatprep.mubr.msk.bf16.mxu0 %vm3127_vm2, %v3126_v22 }
 0x23f   :  { %v2443_v23 = vpop.f32.mrb[2].mxu1  ;;  %v2454_v24 = vpop.f32.mrb[0].mxu0 }
 0x240   :  { %v385_v25 = vpop.f32.mrb[3].mxu1  ;;  %v479_v26 = vpop.f32.mrb[1].mxu0  ;;  %v485_v43 = vadd.f32 %v2454_v24, %v2172_v40  ;;  %v167_v24 = vld [vmem:[%s3954_s12 + $0x8] sm:$0xff] }
 0x241   :  { %v394_v27 = vpack.c.bf16 %v2443_v23, %v385_v25  ;;  %v480_v41 = vadd.f32 %v2172_v40, %v479_v26  ;;  %v166_v23 = vld [vmem:[%s3954_s12] sm:$0xff]  ;;  %v184_v25 = vld [vmem:[%s3954_s12 + $0x90] sm:$0xff]  ;;  %v185_v26 = vld [vmem:[%s3954_s12 + $0x98] sm:$0xff] }
 0x243   :  { %396 = vrot.lane.b32.xlu0 %v394_v27, %s3128_s30  ;;  %2456 = vmatpush3.bf16.msra.mxu1 %v394_v27 }
 0x244   :  { %2457 = vmatprep.subr.bf16.mxu1 %v3126_v22 }
 0x247   :  { %399 = vrot.lane.b32.xlu0 %v394_v27, %s3971_s23  ;;  %v3490_v27 = vpack.c.bf16 %v167_v24, %v166_v23  ;;  %v211_v23 = vld [vmem:[%s3954_s12 + $0x168] sm:$0xff] }
 0x248   :  { %v3656_v24 = vpack.c.bf16 %v211_v23, %v210_v20 }
 0x2b5   :  { %v397_v30 = vpop.permute.xlu0 %396 }
 0x2b6   :  { %2458 = vmatpush3.bf16.msra.mxu1 %v397_v30  ;;  %v3498_v30 = vpack.c.bf16 %v185_v26, %v184_v25  ;;  %v196_v25 = vld [vmem:[%s3954_s12 + $0xf0] sm:$0xff]  ;;  %v197_v26 = vld [vmem:[%s3954_s12 + $0xf8] sm:$0xff] }
 0x2b7   :  { %2459 = vmatprep.subr.bf16.mxu1 %v3126_v22  ;;  %v3666_v28 = vpack.c.bf16 %v197_v26, %v196_v25 }
 0x2b9   :  { %v400_v32 = vpop.permute.xlu0 %399 }
 0x2ba   :  { %2460 = vmatpush3.bf16.msra.mxu1 %v400_v32  ;;  %v169_v32 = vld [vmem:[%s3954_s12 + $0x18] sm:$0xff] }
 0x2bb   :  { %2677 = vmatprep.subr.bf16.mxu1 %v2676_v31 }
 0x2bd   :  { %2462 = vmatmul.mubr.msk.bf16.vlgmr.msra.gmra.mrb[4].mxu1 %vm493_vm3, %v3376_v33 }
 0x2be   :  { %2679 = vmatpush3.bf16.msra.mxu1 %v2676_v31  ;;  %v168_v31 = vld [vmem:[%s3954_s12 + $0x10] sm:$0xff] }
 0x2bf   :  { %2681 = vmatprep.subr.bf16.mxu1 %v2680_v36  ;;  %v3518_v40 = vpack.c.bf16 %v169_v32, %v168_v31  ;;  %v181_v31 = vld [vmem:[%s3954_s12 + $0x78] sm:$0xff] }
 0x2c0   :  { %v3675_v32 = vpack.c.bf16 %v181_v31, %v180_v29 }
 0x2c2   :  { %2683 = vmatpush3.bf16.msra.mxu1 %v2680_v36  ;;  %v187_v36 = vld [vmem:[%s3954_s12 + $0xa8] sm:$0xff] }
 0x2c3   :  { %2693 = vmatprep.subr.bf16.mxu1 %v2692_v39 }
 0x390   :  { %v531_v42 = vpop.f32.mrb[4].mxu1 }
 0x391   :  { %v538_v44 = vadd.f32 %v531_v42, %v480_v41  ;;  %v2463_v45 = vpop.f32.mrb[5].mxu1  ;;  %v202_v41 = vld [vmem:[%s3954_s12 + $0x120] sm:$0xff]  ;;  %v203_v42 = vld [vmem:[%s3954_s12 + $0x128] sm:$0xff] }
 0x392   :  { %v534_v46 = vpop.f32.mrb[6].mxu1  ;;  %v170_v45 = vld [vmem:[%s3954_s12 + $0x20] sm:$0xff] }
 0x393   :  { %v540_v49 = vmax.f32 %v538_v44, 0.0  ;;  %v539_v50 = vadd.f32 %v534_v46, %v485_v43  ;;  %v2464_v51 = vpop.f32.mrb[7].mxu1  ;;  %v3528_v44 = vpack.c.bf16 %v187_v36, %v186_v35  ;;  %v171_v46 = vld [vmem:[%s3954_s12 + $0x28] sm:$0xff]  ;;  %v213_v35 = vld [vmem:[%s3954_s12 + $0x178] sm:$0xff] }
 0x394   :  { %v204_v51 = vld [vmem:[%s3954_s12 + $0x130] sm:$0xff] }
 0x395   :  { %v541_v54 = vmax.f32 %v539_v50, 0.0  ;;  %2479 = vmatprep.mubr.msk.f32.mxu1 %vm312_vm1, %v540_v49  ;;  %v3548_v50 = vpack.c.bf16 %v171_v46, %v170_v45  ;;  %v3573_v58 = vpack.c.bf16 %v205_v52, %v204_v51  ;;  %v3694_v46 = vld [vmem:[#allocation8] sm:$0xff]  ;;  %v3700_v51 = vld [vmem:[#allocation8 + $0x8] ss:$12 sps:$4 sm:$0xff]  }
 0x396   :  { %v162_v2 = vunpack.c.l.bf16 %v3700_v51  ;;  %v165_v3 = vunpack.c.h.bf16 %v3700_v51 }
 0x397   :  { %v542_v59 = vpack.c.bf16 %v541_v54, %v540_v49  ;;  %2480 = vmatmul.mubr.msk.f32.vlgmr.msra.gmra.mrb[8].mxu1 %vm312_vm1, %v541_v54 }
 0x398   :  { %2695 = vmatpush3.bf16.msra.mxu1 %v2692_v39 }
 0x399   :  { %2466 = vmatpush3.bf16.msra.mxu0 %v542_v59  ;;  %2697 = vmatprep.subr.bf16.mxu1 %v2696_v55 }
 0x39a   :  { %2669 = vmatprep.subr.bf16.mxu0 %v2668_v56  ;;  %v190_v56 = vld [vmem:[%s3954_s12 + $0xc0] sm:$0xff] }
 0x39c   :  { %2468 = vmatmul.mubr.msk.bf16.vlgmr.msra.gmra.mrb[4].mxu0 %vm548_vm4, %v3421_v62  ;;  %2699 = vmatpush3.bf16.msra.mxu1 %v2696_v55  ;;  %v173_v55 = vld [vmem:[%s3954_s12 + $0x38] sm:$0xff] }
 0x39d   :  { %2671 = vmatpush1.bf16.msra.mxu0 %v2670_v63  ;;  %687 = vmatprep.mubr.f32.mxu0 %v3126_v22  ;;  %v3585_v63 = vpack.c.bf16 %v191_v57, %v190_v56  ;;  %v160_v56 = vunpack.c.l.bf16 %v3694_v46 }
 0x39e   :  { %2673 = vmatprep.subr.bf16.mxu0 %v2672_v0  ;;  %2733 = vmatprep.subr.bf16.mxu1 %v3474_v21  ;;  %v174_v0 = vld [vmem:[%s3954_s12 + $0x40] sm:$0xff] }
 0x3a1   :  { %2675 = vmatpush1.bf16.msra.mxu0 %v2674_v5  ;;  %v3604_v5 = vpack.c.bf16 %v175_v1, %v174_v0 }
 0x3a2   :  { %2685 = vmatprep.subr.bf16.mxu0 %v2684_v6  ;;  %v208_v6 = vld [vmem:[%s3954_s12 + $0x150] sm:$0xff] }
 0x3a3   :  { %v3629_v13 = vpack.c.bf16 %v209_v7, %v208_v6 }
 0x3a4   :  { %2179 = vmatmul.mubr.msk.f32.vlgmr.msra.gmra.mrb[2].mxu0 %vm312_vm1, %v540_v49  ;;  %v3545_v49 = vpack.c.bf16 %v203_v42, %v202_v41  ;;  %v933_v42 = vld [vmem:[#allocation10] sm:$0x7] }
 0x3a5   :  { %693 = vmatprep.mubr.f32.mxu0 %v3126_v22  ;;  %2687 = vmatpush1.bf16.msra.mxu0 %v2686_v11  ;;  %v194_v11 = vld [vmem:[%s3954_s12 + $0xe0] sm:$0xff] }
 0x3a6   :  { %2689 = vmatprep.subr.bf16.mxu0 %v2688_v12  ;;  %v195_v12 = vld [vmem:[%s3954_s12 + $0xe8] sm:$0xff] }
 0x3a8   :  { %2180 = vmatmul.mubr.msk.f32.gmra.mrb[8].mxu0 %vm312_vm1, %v541_v54  ;;  %v172_v54 = vld [vmem:[%s3954_s12 + $0x30] sm:$0xff] }
 0x3a9   :  { %2691 = vmatpush1.bf16.msra.mxu0 %v2690_v15  ;;  %845 = vmatprep.mubr.f32.mxu0 %v3126_v22  ;;  %v3576_v59 = vpack.c.bf16 %v173_v55, %v172_v54  ;;  %v3635_v15 = vpack.c.bf16 %v195_v12, %v194_v11  ;;  %v161_v55 = vunpack.c.h.bf16 %v3694_v46  ;;  %v164_v12 = vunpack.c.h.bf16 %v3706_v61 }
 0x3aa   :  { %2701 = vmatprep.subr.bf16.mxu0 %v3466_v18 }
 0x46f   :  { %v586_v34 = vpop.f32.mrb[4].mxu0 }
 0x470   :  { %v2469_v37 = vpop.f32.mrb[5].mxu0  ;;  %2183 = vmatmul.mubr.msk.f32.vlgmr.msra.gmra.mrb[2].mxu0 %vm312_vm1, %v586_v34  ;;  %2490 = vmatprep.mubr.msk.f32.mxu1 %vm312_vm1, %v586_v34  ;;  %v212_v34 = vld [vmem:[%s3954_s12 + $0x170] sm:$0xff] }
 0x471   :  { %v589_v39 = vpop.f32.mrb[6].mxu0  ;;  %851 = vmatprep.mubr.f32.mxu0 %v3126_v22  ;;  %2703 = vmatpush3.bf16.msra.mxu0 %v3490_v27  ;;  %v3684_v36 = vpack.c.bf16 %v213_v35, %v212_v34  ;;  %v935_v37 = vlaneseq  ;;  %v2187_v35 = vld [vmem:[%s3948_s6 + $0x20] sm:$0xff] }
 0x472   :  { %v2470_v43 = vpop.f32.mrb[7].mxu0  ;;  %2491 = vmatmul.mubr.msk.f32.vlgmr.msra.gmra.mrb[8].mxu1 %vm312_vm1, %v589_v39  ;;  %2705 = vmatprep.subr.bf16.mxu0 %v3498_v30 }
 0x473   :  { %2735 = vmatpush3.bf16.msra.mxu1 %v3474_v21 }
 0x474   :  { %2184 = vmatmul.mubr.msk.f32.gmra.mrb[8].mxu0 %vm312_vm1, %v589_v39  ;;  %2737 = vmatprep.subr.bf16.mxu1 %v3514_v38  ;;  %v3689_v39 = vshrl.u32 %v935_v37, 7  ;;  %v2188_v37 = vld [vmem:[%s3948_s6 + $0x28] sm:$0xff] }
 0x475   :  { %2707 = vmatpush3.bf16.msra.mxu0 %v3518_v40 }
 0x476   :  { %2709 = vmatprep.subr.bf16.mxu0 %v3528_v44  ;;  %v937_v41 = vsub.s32 0, %v3689_v39  ;;  %v941_v43 = vsub.s32 1, %v3689_v39  ;;  %v945_v45 = vsub.s32 2, %v3689_v39  ;;  %v1980_v39 = vld [vmem:[%s3956_s14 + $0x8] sm:$0xff] }
 0x477   :  { %2739 = vmatpush3.bf16.msra.mxu1 %v3514_v38 }
 0x478   :  { %2741 = vmatprep.subr.bf16.mxu1 %v3545_v49  ;;  %v938_v47 = vrot.slane %v933_v42, %v937_v41  ;;  %v942_v48 = vrot.slane %v933_v42, %v941_v43  ;;  %v946_v52 = vrot.slane %v933_v42, %v945_v45  ;;  %v2193_v42 = vld [vmem:[%s3949_s7 + $0x20] sm:$0xff] }
 0x479   :  { %2711 = vmatpush3.bf16.msra.mxu0 %v3548_v50 }
 0x47a   :  { %2713 = vmatprep.subr.bf16.mxu0 %v3557_v53 }
 0x47b   :  { %2743 = vmatpush3.bf16.msra.mxu1 %v3545_v49 }
 0x47c   :  { %2745 = vmatprep.subr.bf16.mxu1 %v3573_v58 }
 0x47d   :  { %2715 = vmatpush3.bf16.msra.mxu0 %v3576_v59 }
 0x47e   :  { %2717 = vmatprep.subr.bf16.mxu0 %v3585_v63 }
 0x47f   :  { %2747 = vmatpush3.bf16.msra.mxu1 %v3573_v58 }
 0x480   :  { %2749 = vmatprep.subr.bf16.mxu1 %v3601_v4 }
 0x481   :  { %2719 = vmatpush3.bf16.msra.mxu0 %v3604_v5 }
 0x482   :  { %2721 = vmatprep.subr.bf16.mxu0 %v3613_v8 }
 0x483   :  { %2751 = vmatpush3.bf16.msra.mxu1 %v3601_v4 }
 0x484   :  { %2753 = vmatprep.subr.bf16.mxu1 %v3629_v13 }
 0x485   :  { %2723 = vmatpush3.bf16.msra.mxu0 %v3632_v14 }
 0x486   :  { %2725 = vmatprep.subr.bf16.mxu0 %v3635_v15 }
 0x487   :  { %2755 = vmatpush3.bf16.msra.mxu1 %v3629_v13 }
 0x488   :  { %2757 = vmatprep.subr.bf16.mxu1 %v3656_v24 }
 0x489   :  { %2727 = vmatpush3.bf16.msra.mxu0 %v3648_v19 }
 0x48a   :  { %2729 = vmatprep.subr.bf16.mxu0 %v3666_v28 }
 0x48b   :  { %2759 = vmatpush3.bf16.msra.mxu1 %v3656_v24 }
 0x48c   :  { %2761 = vmatprep.subr.bf16.mxu1 %v3684_v36 }
 0x48d   :  { %2731 = vmatpush3.bf16.msra.mxu0 %v3675_v32 }
 0x48f   :  { %2763 = vmatpush3.bf16.msra.mxu1 %v3684_v36 }
 0x543   :  { %v847_v54 = vpop.f32.mrb[2].mxu0 }
 0x544   :  { %v950_v57 = vadd.f32 %v938_v47, %v847_v54  ;;  %v849_v60 = vpop.f32.mrb[3].mxu0  ;;  %v2189_v54 = vld [vmem:[%s3948_s6 + $0x30] sm:$0xff] }
 0x545   :  { %v951_v0 = vadd.f32 %v942_v48, %v849_v60  ;;  %v2492_v1 = vpop.f32.mrb[8].mxu1  ;;  %v2195_v60 = vld [vmem:[%s3949_s7 + $0x30] sm:$0xff] }
 0x546   :  { %v955_v6 = vadd.f32 %v2492_v1, %v946_v52  ;;  %v924_v7 = vpop.f32.mrb[9].mxu1  ;;  %v956_v16 = vmul.f32 %v950_v57, %v160_v56  ;;  %v2190_v57 = vld [vmem:[%s3948_s6 + $0x38] sm:$0xff] }
 0x547   :  { %v957_v9 = vmul.f32 %v951_v0, %v161_v55  ;;  %v952_v10 = vadd.f32 %v946_v52, %v924_v7  ;;  %v853_v11 = vpop.f32.mrb[8].mxu0  ;;  %v2768_v0 = vpack.c.bf16 %v2190_v57, %v2189_v54  ;;  %v2196_v1 = vld [vmem:[%s3949_s7 + $0x38] sm:$0xff]  ;;  %v2220_v54 = vld [vmem:[%s3952_s10 + $0x88] sm:$0xff] }
 0x548   :  { %v953_v20 = vadd.f32 %v938_v47, %v853_v11  ;;  %v855_v23 = vpop.f32.mrb[9].mxu0  ;;  %v961_v29 = vmul.f32 %v955_v6, %v165_v3  ;;  %v2764_v47 = vpack.c.bf16 %v2188_v37, %v2187_v35  ;;  %v2776_v6 = vpack.c.bf16 %v2196_v1, %v2195_v60  ;;  %v2223_v1 = vld [vmem:[%s3952_s10 + $0xa0] sm:$0xff] }
 0x549   :  { %v958_v25 = vmul.f32 %v952_v10, %v162_v2  ;;  %v954_v26 = vadd.f32 %v942_v48, %v855_v23  ;;  %1026 = vmatprep.mubr.f32.mxu0 %v957_v9  ;;  %v2194_v48 = vld [vmem:[%s3949_s7 + $0x28] sm:$0xff] }
 0x54a   :  { %1027 = vmatmul.mubr.f32.vlgmr.msra.gmra.mrb[10].mxu0 %v956_v16  ;;  %v959_v34 = vmul.f32 %v953_v20, %v163_v17  ;;  %v2772_v52 = vpack.c.bf16 %v2194_v48, %v2193_v42  ;;  %2765 = vmatprep.subr.bf16.mxu0 %v2764_v47 }
 0x54b   :  { %v960_v31 = vmul.f32 %v954_v26, %v164_v12  ;;  %2525 = vmatprep.mubr.f32.mxu1 %v958_v25  ;;  %2767 = vmatpush3.bf16.msra.mxu0 %v2764_v47 }
 0x54c   :  { %2526 = vmatmul.mubr.f32.vlgmr.msra.gmra.mrb[10].mxu1 %v961_v29  ;;  %2773 = vmatprep.subr.bf16.mxu1 %v2772_v52 }
 0x54d   :  { %1031 = vmatprep.mubr.f32.mxu0 %v960_v31  ;;  %2775 = vmatpush3.bf16.msra.mxu1 %v2772_v52  ;;  %v2217_v52 = vld [vmem:[%s3952_s10 + $0x70] sm:$0xff] }
 0x54e   :  { %1032 = vmatmul.mubr.f32.gmra.mrb[12].mxu0 %v959_v34  ;;  %2769 = vmatprep.subr.bf16.mxu0 %v2768_v0  ;;  %v2788_v60 = vpack.c.bf16 %v2220_v54, %v2217_v52 }
 0x54f   :  { %2777 = vmatprep.subr.bf16.mxu1 %v2776_v6  ;;  %2771 = vmatpush3.bf16.msra.mxu0 %v2768_v0 }
 0x550   :  { %2550 = vmatprep.subr.bf16.mxu0 %v3126_v22 }
 0x551   :  { %2779 = vmatpush3.bf16.msra.mxu1 %v2776_v6  ;;  %v2226_v6 = vld [vmem:[%s3952_s10 + $0xb8] sm:$0xff] }
 0x552   :  { %2560 = vmatprep.subr.bf16.mxu1 %v3126_v22 }
 0x61d   :  { %v2305_v7 = vpop.f32.mrb[10].mxu0 }
 0x61e   :  { %v2306_v9 = vpop.f32.mrb[11].mxu0 }
 0x61f   :  { %v2307_v10 = vadd.f32 %v2306_v9, %v2305_v7  ;;  %v2527_v11 = vpop.f32.mrb[10].mxu1  ;;  %v2792_v7 = vpack.c.bf16 %v2226_v6, %v2223_v1  ;;  %v2205_v9 = vld [vmem:[%s3951_s9 + $0x70] sm:$0xff]  ;;  %v2222_v6 = vld [vmem:[%s3952_s10 + $0x98] sm:$0xff] }
 0x620   :  { %v1103_v16 = vpop.f32.mrb[11].mxu1 }
 0x621   :  { %v1104_v20 = vadd.f32 %v2307_v10, %v1103_v16  ;;  %v2308_v23 = vpop.f32.mrb[12].mxu0 }
 0x622   :  { %v2309_v25 = vpop.f32.mrb[13].mxu0 }
 0x623   :  { %v1112_v26 = vmax.f32 %v1104_v20, 0.0  ;;  %v2310_v29 = vadd.f32 %v2309_v25, %v2308_v23 }
 0x625   :  { %v1109_v31 = vadd.f32 %v2527_v11, %v2310_v29  ;;  %2536 = vmatprep.mubr.msk.f32.mxu0 %vm312_vm1, %v1112_v26  ;;  %2547 = vmatprep.mubr.msk.f32.mxu1 %vm312_vm1, %v1112_v26  ;;  %v2198_v11 = vld [vmem:[%s3950_s8 + $0x1] ss:$0 sm:$0xff] }
 0x627   :  { %v1113_v34 = vmax.f32 %v1109_v31, 0.0  ;;  %v2211_v31 = vld [vmem:[%s3951_s9 + $0xa0] sm:$0xff] }
 0x629   :  { %2537 = vmatmul.mubr.msk.f32.vlgmr.msra.gmra.mrb[14].mxu0 %vm312_vm1, %v1113_v34  ;;  %2548 = vmatmul.mubr.msk.f32.vlgmr.msra.gmra.mrb[12].mxu1 %vm312_vm1, %v1113_v34  ;;  %v2214_v34 = vld [vmem:[%s3951_s9 + $0xb8] sm:$0xff] }
 0x62a   :  { %2556 = vmatprep.mubr.msk.bf16.mxu0 %vm3127_vm2, %v3126_v22  ;;  %2562 = vmatprep.mubr.msk.bf16.mxu1 %vm3127_vm2, %v3126_v22  ;;  %v2808_v54 = vpack.c.bf16 %v2214_v34, %v2211_v31  ;;  %v2213_v31 = vld [vmem:[%s3951_s9 + $0xb0] sm:$0xff] }
 0x6fc   :  { %v2538_v35 = vpop.f32.mrb[14].mxu0  ;;  %v2549_v37 = vpop.f32.mrb[12].mxu1 }
 0x6fd   :  { %v1191_v42 = vpop.f32.mrb[15].mxu0  ;;  %v1287_v47 = vpop.f32.mrb[13].mxu1  ;;  %v1293_v23 = vadd.f32 %v2549_v37, %v2198_v11  ;;  %v2219_v37 = vld [vmem:[%s3952_s10 + $0x80] sm:$0xff] }
 0x6fe   :  { %v1200_v48 = vpack.c.bf16 %v2538_v35, %v1191_v42  ;;  %v1288_v16 = vadd.f32 %v2198_v11, %v1287_v47  ;;  %v2216_v47 = vld [vmem:[%s3952_s10 + $0x68] sm:$0xff]  ;;  %v2221_v11 = vld [vmem:[%s3952_s10 + $0x90] sm:$0xff] }
 0x700   :  { %1202 = vrot.lane.b32.xlu1 %v1200_v48, %s3128_s30  ;;  %2551 = vmatpush3.bf16.msra.mxu0 %v1200_v48 }
 0x701   :  { %2552 = vmatprep.subr.bf16.mxu0 %v3126_v22 }
 0x704   :  { %1205 = vrot.lane.b32.xlu1 %v1200_v48, %s3971_s23 }
 0x772   :  { %v1203_v57 = vpop.permute.xlu1 %1202 }
 0x773   :  { %2553 = vmatpush3.bf16.msra.mxu0 %v1203_v57  ;;  %v2780_v57 = vpack.c.bf16 %v2219_v37, %v2216_v47  ;;  %v2212_v47 = vld [vmem:[%s3951_s9 + $0xa8] sm:$0xff] }
 0x774   :  { %2554 = vmatprep.subr.bf16.mxu0 %v3126_v22 }
 0x776   :  { %v1206_v0 = vpop.permute.xlu1 %1205 }
 0x777   :  { %2555 = vmatpush3.bf16.msra.mxu0 %v1206_v0  ;;  %v2218_v0 = vld [vmem:[%s3952_s10 + $0x78] sm:$0xff] }
 0x778   :  { %2789 = vmatprep.subr.bf16.mxu0 %v2788_v60 }
 0x77a   :  { %2557 = vmatmul.mubr.msk.bf16.vlgmr.msra.gmra.mrb[16].mxu0 %vm493_vm3, %v3376_v33  ;;  %v2208_v33 = vld [vmem:[%s3951_s9 + $0x88] sm:$0xff] }
 0x77b   :  { %2791 = vmatpush3.bf16.msra.mxu0 %v2788_v60  ;;  %v2804_v10 = vpack.c.bf16 %v2208_v33, %v2205_v9  ;;  %v2215_v60 = vld [vmem:[%s3952_s10 + $0x60] sm:$0xff] }
 0x77c   :  { %2793 = vmatprep.subr.bf16.mxu0 %v2792_v7  ;;  %v2782_v9 = vpack.c.bf16 %v2218_v0, %v2215_v60 }
 0x77f   :  { %2795 = vmatpush3.bf16.msra.mxu0 %v2792_v7  ;;  %v2225_v7 = vld [vmem:[%s3952_s10 + $0xb0] sm:$0xff] }
 0x780   :  { %2805 = vmatprep.subr.bf16.mxu0 %v2804_v10  ;;  %v2784_v33 = vpack.c.bf16 %v2225_v7, %v2222_v6  ;;  %v1905_v6 = vld [vmem:[#allocation11] sm:$0xff]  ;;  %v2064_v7 = vld [vmem:[#allocation13] sm:$0xff] }
 0x84d   :  { %v1330_v20 = vpop.f32.mrb[16].mxu0 }
 0x84e   :  { %v1337_v25 = vadd.f32 %v1330_v20, %v1288_v16  ;;  %v2558_v26 = vpop.f32.mrb[17].mxu0  ;;  %v2224_v16 = vld [vmem:[%s3952_s10 + $0xa8] sm:$0xff] }
 0x84f   :  { %v1333_v29 = vpop.f32.mrb[18].mxu0  ;;  %v2204_v20 = vld [vmem:[%s3951_s9 + $0x68] sm:$0xff]  ;;  %v2203_v26 = vld [vmem:[%s3951_s9 + $0x60] sm:$0xff] }
 0x850   :  { %v1339_v35 = vmax.f32 %v1337_v25, 0.0  ;;  %v1338_v42 = vadd.f32 %v1333_v29, %v1293_v23  ;;  %v2559_v48 = vpop.f32.mrb[19].mxu0  ;;  %v2786_v23 = vpack.c.bf16 %v2224_v16, %v2221_v11  ;;  %v2206_v29 = vld [vmem:[%s3951_s9 + $0x78] sm:$0xff] }
 0x851   :  { %v2798_v34 = vpack.c.bf16 %v2206_v29, %v2203_v26  ;;  %v2209_v48 = vld [vmem:[%s3951_s9 + $0x90] sm:$0xff] }
 0x852   :  { %v1340_v52 = vmax.f32 %v1338_v42, 0.0  ;;  %2574 = vmatprep.mubr.msk.f32.mxu0 %vm312_vm1, %v1339_v35  ;;  %v2802_v37 = vpack.c.bf16 %v2212_v47, %v2209_v48 }
 0x854   :  { %v1341_v1 = vpack.c.bf16 %v1340_v52, %v1339_v35  ;;  %2575 = vmatmul.mubr.msk.f32.vlgmr.msra.gmra.mrb[20].mxu0 %vm312_vm1, %v1340_v52 }
 0x855   :  { %2807 = vmatpush3.bf16.msra.mxu0 %v2804_v10  ;;  %v2207_v10 = vld [vmem:[%s3951_s9 + $0x80] sm:$0xff] }
 0x856   :  { %2561 = vmatpush3.bf16.msra.mxu1 %v1341_v1  ;;  %2809 = vmatprep.subr.bf16.mxu0 %v2808_v54  ;;  %v2796_v25 = vpack.c.bf16 %v2207_v10, %v2204_v20  ;;  %v2066_v20 = vld [vmem:[#allocation13 + $0x10] sm:$0xff]  ;;  %v2067_v10 = vld [vmem:[#allocation13 + $0x18] sm:$0xff] }
 0x857   :  { %2781 = vmatprep.subr.bf16.mxu1 %v2780_v57 }
 0x859   :  { %2563 = vmatmul.mubr.msk.bf16.vlgmr.msra.gmra.mrb[16].mxu1 %vm548_vm4, %v3421_v62  ;;  %2811 = vmatpush3.bf16.msra.mxu0 %v2808_v54  ;;  %v2210_v62 = vld [vmem:[%s3951_s9 + $0x98] sm:$0xff] }
 0x85a   :  { %2783 = vmatpush1.bf16.msra.mxu1 %v2782_v9  ;;  %1479 = vmatprep.mubr.f32.mxu1 %v3126_v22  ;;  %v2800_v42 = vpack.c.bf16 %v2213_v31, %v2210_v62  ;;  %v2065_v9 = vld [vmem:[#allocation13 + $0x8] sm:$0xff]  ;;  %v2238_v31 = vld [vmem:[%s3959_s17] ss:$0 sm:$0xff] }
 0x85b   :  { %2785 = vmatprep.subr.bf16.mxu1 %v2784_v33  ;;  %2845 = vmatprep.subr.bf16.mxu0 %v3474_v21  ;;  %v2886_v33 = vpack.c.bf16 %v2065_v9, %v2064_v7 }
 0x85e   :  { %2787 = vmatpush1.bf16.msra.mxu1 %v2786_v23  ;;  %v2889_v23 = vpack.c.bf16 %v2067_v10, %v2066_v20 }
 0x85f   :  { %2797 = vmatprep.subr.bf16.mxu1 %v2796_v25  ;;  %v2236_v25 = vld [vmem:[%s3957_s15] ss:$0 sm:$0xff] }
 0x861   :  { %2227 = vmatmul.mubr.msk.f32.vlgmr.msra.gmra.mrb[14].mxu1 %vm312_vm1, %v1339_v35 }
 0x862   :  { %1485 = vmatprep.mubr.f32.mxu1 %v3126_v22  ;;  %2799 = vmatpush1.bf16.msra.mxu1 %v2798_v34 }
 0x863   :  { %2801 = vmatprep.subr.bf16.mxu1 %v2800_v42 }
 0x865   :  { %2228 = vmatmul.mubr.msk.f32.gmra.mrb[20].mxu1 %vm312_vm1, %v1340_v52 }
 0x866   :  { %2803 = vmatpush1.bf16.msra.mxu1 %v2802_v37  ;;  %1637 = vmatprep.mubr.f32.mxu1 %v3126_v22 }
 0x867   :  { %2813 = vmatprep.subr.bf16.mxu1 %v3466_v18  ;;  %v1726_v18 = vld [vmem:[#allocation10 + $0x3] sm:$0x7] }
 0x92c   :  { %v1376_v54 = vpop.f32.mrb[16].mxu1 }
 0x92d   :  { %v2564_v57 = vpop.f32.mrb[17].mxu1  ;;  %2231 = vmatmul.mubr.msk.f32.vlgmr.msra.gmra.mrb[14].mxu1 %vm312_vm1, %v1376_v54  ;;  %2585 = vmatprep.mubr.msk.f32.mxu0 %vm312_vm1, %v1376_v54 }
 0x92e   :  { %v1379_v60 = vpop.f32.mrb[18].mxu1  ;;  %1643 = vmatprep.mubr.f32.mxu1 %v3126_v22  ;;  %2815 = vmatpush3.bf16.msra.mxu1 %v3490_v27  ;;  %v1735_v27 = vrot.slane %v1726_v18, %v941_v43 }
 0x92f   :  { %v2565_v35 = vpop.f32.mrb[19].mxu1  ;;  %2586 = vmatmul.mubr.msk.f32.vlgmr.msra.gmra.mrb[20].mxu0 %vm312_vm1, %v1379_v60  ;;  %2817 = vmatprep.subr.bf16.mxu1 %v3498_v30  ;;  %v1739_v30 = vrot.slane %v1726_v18, %v945_v45  ;;  %v1982_v45 = vld [vmem:[%s3956_s14 + $0x18] sm:$0xff] }
 0x930   :  { %2847 = vmatpush3.bf16.msra.mxu0 %v3474_v21  ;;  %v1731_v21 = vrot.slane %v1726_v18, %v937_v41  ;;  %v1981_v41 = vld [vmem:[%s3956_s14 + $0x10] sm:$0xff] }
 0x931   :  { %2232 = vmatmul.mubr.msk.f32.gmra.mrb[20].mxu1 %vm312_vm1, %v1379_v60  ;;  %2849 = vmatprep.subr.bf16.mxu0 %v3514_v38  ;;  %v2883_v46 = vpack.c.bf16 %v1982_v45, %v1981_v41 }
 0x932   :  { %2819 = vmatpush3.bf16.msra.mxu1 %v3518_v40 }
 0x933   :  { %2821 = vmatprep.subr.bf16.mxu1 %v3528_v44 }
 0x934   :  { %2851 = vmatpush3.bf16.msra.mxu0 %v3514_v38 }
 0x935   :  { %2853 = vmatprep.subr.bf16.mxu0 %v3545_v49 }
 0x936   :  { %2823 = vmatpush3.bf16.msra.mxu1 %v3548_v50 }
 0x937   :  { %2825 = vmatprep.subr.bf16.mxu1 %v3557_v53 }
 0x938   :  { %2855 = vmatpush3.bf16.msra.mxu0 %v3545_v49 }
 0x939   :  { %2857 = vmatprep.subr.bf16.mxu0 %v3573_v58 }
 0x93a   :  { %2827 = vmatpush3.bf16.msra.mxu1 %v3576_v59 }
 0x93b   :  { %2829 = vmatprep.subr.bf16.mxu1 %v3585_v63 }
 0x93c   :  { %2859 = vmatpush3.bf16.msra.mxu0 %v3573_v58 }
 0x93d   :  { %2861 = vmatprep.subr.bf16.mxu0 %v3601_v4 }
 0x93e   :  { %2831 = vmatpush3.bf16.msra.mxu1 %v3604_v5 }
 0x93f   :  { %2833 = vmatprep.subr.bf16.mxu1 %v3613_v8 }
 0x940   :  { %2863 = vmatpush3.bf16.msra.mxu0 %v3601_v4 }
 0x941   :  { %2865 = vmatprep.subr.bf16.mxu0 %v3629_v13 }
 0x942   :  { %2835 = vmatpush3.bf16.msra.mxu1 %v3632_v14 }
 0x943   :  { %2837 = vmatprep.subr.bf16.mxu1 %v3635_v15 }
 0x944   :  { %2867 = vmatpush3.bf16.msra.mxu0 %v3629_v13 }
 0x945   :  { %2869 = vmatprep.subr.bf16.mxu0 %v3656_v24 }
 0x946   :  { %2839 = vmatpush3.bf16.msra.mxu1 %v3648_v19 }
 0x947   :  { %2841 = vmatprep.subr.bf16.mxu1 %v3666_v28 }
 0x948   :  { %2871 = vmatpush3.bf16.msra.mxu0 %v3656_v24 }
 0x949   :  { %2873 = vmatprep.subr.bf16.mxu0 %v3684_v36 }
 0x94a   :  { %2843 = vmatpush3.bf16.msra.mxu1 %v3675_v32  ;;  %v3129_v32 = vmov 0.0|0.0  }
 0x94b   :  { %2879 = vmatprep.subr.bf16.mxu1 %v3129_v32 }
 0x94c   :  { %2875 = vmatpush3.bf16.msra.mxu0 %v3684_v36  ;;  %v1979_v36 = vld [vmem:[%s3956_s14] sm:$0xff] }
 0x94d   :  { %2876 = vmatprep.subr.bf16.mxu0 %v3129_v32  ;;  %v2880_v43 = vpack.c.bf16 %v1980_v39, %v1979_v36 }
 0xa00   :  { %v1639_v38 = vpop.f32.mrb[14].mxu1 }
 0xa01   :  { %v1743_v40 = vadd.f32 %v1731_v21, %v1639_v38  ;;  %v1641_v44 = vpop.f32.mrb[15].mxu1 }
 0xa02   :  { %v1744_v49 = vadd.f32 %v1735_v27, %v1641_v44  ;;  %v2587_v50 = vpop.f32.mrb[20].mxu0 }
 0xa03   :  { %v1748_v53 = vadd.f32 %v2587_v50, %v1739_v30  ;;  %v1716_v58 = vpop.f32.mrb[21].mxu0  ;;  %v1749_v5 = vmul.f32 %v1743_v40, %v160_v56 }
 0xa04   :  { %v1750_v59 = vmul.f32 %v1744_v49, %v161_v55  ;;  %v1745_v63 = vadd.f32 %v1739_v30, %v1716_v58  ;;  %v1645_v4 = vpop.f32.mrb[20].mxu1 }
 0xa05   :  { %v1746_v8 = vadd.f32 %v1731_v21, %v1645_v4  ;;  %v1647_v13 = vpop.f32.mrb[21].mxu1  ;;  %v1754_v19 = vmul.f32 %v1748_v53, %v165_v3 }
 0xa06   :  { %v1751_v14 = vmul.f32 %v1745_v63, %v162_v2  ;;  %v1747_v15 = vadd.f32 %v1735_v27, %v1647_v13  ;;  %1819 = vmatprep.mubr.f32.mxu1 %v1750_v59 }
 0xa07   :  { %1820 = vmatmul.mubr.f32.vlgmr.msra.gmra.mrb[22].mxu1 %v1749_v5  ;;  %v1752_v28 = vmul.f32 %v1746_v8, %v163_v17 }
 0xa08   :  { %v1753_v24 = vmul.f32 %v1747_v15, %v164_v12  ;;  %2620 = vmatprep.mubr.f32.mxu0 %v1751_v14  ;;  %2881 = vmatpush3.bf16.msra.mxu1 %v2880_v43 }
 0xa09   :  { %2621 = vmatmul.mubr.f32.vlgmr.msra.gmra.mrb[22].mxu0 %v1754_v19  ;;  %2882 = vmatprep.subr.bf16.mxu1 %v3129_v32 }
 0xa0a   :  { %1824 = vmatprep.mubr.f32.mxu1 %v1753_v24  ;;  %2627 = vmatprep.mubr.msk.f32.mxu0 %vm3127_vm2, %v3126_v22 }
 0xa0b   :  { %1825 = vmatmul.mubr.f32.gmra.mrb[24].mxu1 %v1752_v28 }
 0xa0c   :  { %2638 = vmatprep.mubr.msk.f32.mxu1 %vm3127_vm2, %v3126_v22  ;;  %2884 = vmatpush3.bf16.msra.mxu1 %v2883_v46 }
 0xada   :  { %v2391_v51 = vpop.f32.mrb[22].mxu1 }
 0xadb   :  { %v2392_v55 = vpop.f32.mrb[23].mxu1 }
 0xadc   :  { %v2393_v56 = vadd.f32 %v2392_v55, %v2391_v51  ;;  %v2622_v61 = vpop.f32.mrb[22].mxu0 }
 0xadd   :  { %v1896_v2 = vpop.f32.mrb[23].mxu0 }
 0xade   :  { %v1897_v3 = vadd.f32 %v2393_v56, %v1896_v2  ;;  %v2394_v12 = vpop.f32.mrb[24].mxu1 }
 0xadf   :  { %v2395_v17 = vpop.f32.mrb[25].mxu1 }
 0xae0   :  { %v2396_v52 = vadd.f32 %v2395_v17, %v2394_v12 }
 0xae2   :  { %v1902_v0 = vadd.f32 %v2622_v61, %v2396_v52 }
 0xae4   :  { %v2877_v1 = vpack.c.bf16 %v1902_v0, %v1897_v3 }
 0xae6   :  { %2878 = vmatpush3.bf16.msra.mxu0 %v2877_v1 }
 0xae7   :  { %2885 = vmatprep.subr.bf16.mxu0 %v3129_v32 }
 0xae9   :  { %2628 = vmatmul.mubr.msk.f32.vlgmr.msra.gmra.mrb[24].mxu0 %vm548_vm4, %v1905_v6 }
 0xaea   :  { %2649 = vmatprep.mubr.msk.f32.mxu0 %vm3127_vm2, %v3126_v22  ;;  %2887 = vmatpush3.bf16.msra.mxu0 %v2886_v33 }
 0xaeb   :  { %2888 = vmatprep.subr.bf16.mxu0 %v3129_v32 }
 0xaee   :  { %2890 = vmatpush3.bf16.msra.mxu0 %v2889_v23 }
 0xbbc   :  { %v1975_v11 = vpop.f32.mrb[24].mxu0 }
 0xbbd   :  { %v2629_v16 = vpop.f32.mrb[25].mxu0  ;;  %2639 = vmatmul.mubr.msk.f32.vlgmr.msra.gmra.mrb[26].mxu1 %vm312_vm1, %v1975_v11 }
 0xc90   :  { %v2059_v26 = vpop.f32.mrb[26].mxu1 }
 0xc91   :  { %v2060_v29 = vadd.f32 %v2236_v25, %v2059_v26  ;;  %v2640_v22 = vpop.f32.mrb[27].mxu1 }
 0xc93   :  { %v2063_v62 = vmax.f32 %v2060_v29, 0.0 }
 0xc95   :  { %2650 = vmatmul.mubr.msk.f32.vlgmr.msra.gmra.mrb[26].mxu0 %vm312_vm1, %v2063_v62 }
 0xd68   :  { %v2144_v34 = vpop.f32.mrb[26].mxu0 }
 0xd69   :  { %v2145_v42 = vadd.f32 %v2238_v31, %v2144_v34  ;;  %v2651_v48 = vpop.f32.mrb[27].mxu0 }
 0xd6b   :  { %2148 = vst [vmem:[#allocation14] sm:$0xff] %v2145_v42 }
 0xd6c   :  { %3090 = shalt.err (!%p3087_p4)
}
 0xd6d   :  { %s3091_s21 = scalar_lea.hbm %s3960_s18, 128 }
 0xd6e   :  { %p3092_p5 = scmp.ne.s32.totalorder %s3960_s18, %s3091_s21  ;;  %p3095_p6 = scmp.lt.u32.totalorder %s3091_s21, %s3960_s18 }
 0xd70   :  { %p3097_p7 = pnand %p3095_p6, %p3092_p5 }
 0xd72   :  { %3100 = shalt.err (!%p3097_p7)
}
 0xd73   :  { %2158 = dma.vmem_to_hbm [thread:$0]  %s2156_s28, 128, %s3960_s18, [#allocation4]  }
 0xd74   :  { %3109 = dma.done.wait [#allocation4], 128  }
 0xd75   :  { %3110 = vsyncadd [#allocation4], 4294967168 }
 0xd76   :  { %2162 = vsyncpa [#allocation3], 1 }
 0xd77   :  { %2163 = vsyncpa [#allocation6], 1 }
 0xd78   :  { %2164 = vsyncpa [#allocation9], 1 }
 0xd79   :  { %2165 = vsyncpa [#allocation12], 1 }
 0xd7a   :  { %2166 = vsyncpa [#allocation4], 1 }

</bundles_post_ra>
